<compile_context>
chip_gen: v6e
topology: v6e:2x2x1
jax: 0.10.0
libtpu: 0.0.40
codegen_flags: <defaults>
</compile_context>

<pallas_src>
import functools

import jax
import jax.numpy as jnp
from jax.experimental import pallas as pl
from jax.experimental.pallas import tpu as pltpu


# ----------------------------------------------------------------- utilities

def _vmem_limit_bytes():
    # ~80% of physical VMEM, capped at 112 MiB (v5e/v6e: 128 MiB, v7x: 64 MiB).
    try:
        cap = pltpu.get_tpu_info().vmem_capacity_bytes
    except Exception:
        cap = 64 * 1024 * 1024
    return int(min(cap * 0.8, 112 * 1024 * 1024))


_VMEM_LIMIT = _vmem_limit_bytes()


def _pick_tile(dim, target):
    """Largest tile <= target that divides `dim` and is a multiple of 128,
    falling back to the full dim (small test shapes / awkward sizes)."""
    if dim <= target:
        return dim
    t = (min(target, dim) // 128) * 128
    while t >= 128:
        if dim % t == 0:
            return t
        t -= 128
    return dim


# ------------------------------------------------------------------- kernels

def gate_topk_kernel(x_ref, w_ref, topk_w_ref, topk_i_ref, *,
                     top_k, num_experts, scale):
    # DeepseekV2MoEGate (topk_method='greedy'):
    #   scores = softmax(x_f32 @ W^T);  topk_weight, topk_idx = topk(scores)
    #   topk_weight *= routed_scaling_factor
    # Top-k is fused in-kernel as K iterative argmax passes over the E lanes,
    # so no (T, E) f32 scores tensor ever hits HBM.
    logits = jnp.dot(x_ref[...], w_ref[...],
                     preferred_element_type=jnp.float32)        # (tm, E) f32
    m = jnp.max(logits, axis=-1, keepdims=True)
    p = jnp.exp(logits - m)
    scores = p / jnp.sum(p, axis=-1, keepdims=True)

    tm = scores.shape[0]
    lane = jax.lax.broadcasted_iota(jnp.int32, scores.shape, 1)
    col = jax.lax.broadcasted_iota(jnp.int32, (tm, top_k), 1)
    wout = jnp.zeros((tm, top_k), jnp.float32)
    iout = jnp.zeros((tm, top_k), jnp.int32)
    s = scores
    for j in range(top_k):
        mx = jnp.max(s, axis=-1, keepdims=True)                 # (tm, 1)
        idx = jnp.min(jnp.where(s == mx, lane, num_experts),
                      axis=-1, keepdims=True)                   # (tm, 1) int32
        wout = jnp.where(col == j, mx, wout)
        iout = jnp.where(col == j, idx, iout)
        s = jnp.where(lane == idx, -1.0, s)                     # mask selected
    topk_w_ref[...] = wout * scale
    topk_i_ref[...] = iout
    # TODO(synk): topk_method='group_limited_greedy' not implemented.


def grouped_expert_kernel(be_ref, nrows_ref, w_ref, x_ref, wg_ref, wu_ref,
                          wd_ref, o_ref, g_acc, u_acc, o_acc):
    # Grid: (token block b [parallel], I tile i [arbitrary], H tile k [arbitrary]).
    # be_ref / nrows_ref (SMEM scalar prefetch): per-block expert id and
    # valid-row count.  Fully-padded blocks skip all GEMMs.
    b = pl.program_id(0)
    i = pl.program_id(1)
    k = pl.program_id(2)
    ki = pl.num_programs(1)
    kh = pl.num_programs(2)
    valid = nrows_ref[b] > 0

    @pl.when(k == 0)
    def _():
        g_acc[...] = jnp.zeros_like(g_acc)
        u_acc[...] = jnp.zeros_like(u_acc)

    @pl.when(jnp.logical_and(i == 0, k == 0))
    def _():
        o_acc[...] = jnp.zeros_like(o_acc)

    @pl.when(valid)
    def _():
        x = x_ref[...]                                           # (tm, th) bf16
        g_acc[...] += jnp.dot(x, wg_ref[0], preferred_element_type=jnp.float32)
        u_acc[...] += jnp.dot(x, wu_ref[0], preferred_element_type=jnp.float32)

    @pl.when(jnp.logical_and(valid, k == kh - 1))
    def _():
        h = (jax.nn.silu(g_acc[...]) * u_acc[...]).astype(wd_ref.dtype)
        o_acc[...] += jnp.dot(h, wd_ref[0], preferred_element_type=jnp.float32)

    @pl.when(jnp.logical_and(i == ki - 1, k == kh - 1))
    def _():
        # Routing weight applied in-kernel; bf16 writeback halves HBM traffic.
        o_ref[...] = (o_acc[...] * w_ref[...]).astype(o_ref.dtype)


def shared_mlp_kernel(x_ref, wg_ref, wu_ref, wd_ref, o_ref, acc_ref):
    # Shared experts: down( silu(gate(x)) * up(x) ), SI-tiled streamed GEMM.
    j = pl.program_id(1)

    @pl.when(j == 0)
    def _():
        acc_ref[...] = jnp.zeros_like(acc_ref)

    x = x_ref[...]                                               # (tm, H) bf16
    g = jnp.dot(x, wg_ref[...], preferred_element_type=jnp.float32)
    u = jnp.dot(x, wu_ref[...], preferred_element_type=jnp.float32)
    h = (jax.nn.silu(g) * u).astype(wd_ref.dtype)
    acc_ref[...] += jnp.dot(h, wd_ref[...], preferred_element_type=jnp.float32)

    @pl.when(j == pl.num_programs(1) - 1)
    def _():
        o_ref[...] = acc_ref[...].astype(o_ref.dtype)
    # TODO(synk): also K-tile the H contraction of gate/up for very large H.


# -------------------------------------------------------- one-time weight prep

def prepare_params(params):
    """Hoisted out of the forward path: convert PyTorch [out, in] Linear
    weights to [in, out] kernel layout; expert/shared weights -> bfloat16."""
    return {
        "gate_w_t": params["gate_w"].T.astype(jnp.float32),                   # (H, E)
        "wg_t": jnp.transpose(params["wg"], (0, 2, 1)).astype(jnp.bfloat16),  # (E, H, I)
        "wu_t": jnp.transpose(params["wu"], (0, 2, 1)).astype(jnp.bfloat16),  # (E, H, I)
        "wd_t": jnp.transpose(params["wd"], (0, 2, 1)).astype(jnp.bfloat16),  # (E, I, H)
        "swg_t": params["swg"].T.astype(jnp.bfloat16),                        # (H, SI)
        "swu_t": params["swu"].T.astype(jnp.bfloat16),                        # (H, SI)
        "swd_t": params["swd"].T.astype(jnp.bfloat16),                        # (SI, H)
        # TODO(synk): on v7x store expert weights in fp8 with per-channel
        # scales (native fp8 MXU); keep bf16 on v5e/v6e.
    }


# ------------------------------------------------------------------- wrappers

def deepseek_v2_moe_gate(xt_f32, gate_w_t, *, top_k, routed_scaling_factor, tm):
    """Semantics of DeepseekV2MoEGate.forward (topk_method='greedy'):
    returns (topk_idx, topk_weight) for the (padded) token rows."""
    Tp, H = xt_f32.shape
    E = gate_w_t.shape[1]
    assert Tp % tm == 0
    kernel = functools.partial(gate_topk_kernel, top_k=top_k, num_experts=E,
                               scale=float(routed_scaling_factor))
    topk_w, topk_i = pl.pallas_call(
        kernel,
        out_shape=(jax.ShapeDtypeStruct((Tp, top_k), jnp.float32),
                   jax.ShapeDtypeStruct((Tp, top_k), jnp.int32)),
        grid=(Tp // tm,),
        in_specs=[pl.BlockSpec((tm, H), lambda i: (i, 0)),
                  pl.BlockSpec((H, E), lambda i: (0, 0))],
        out_specs=(pl.BlockSpec((tm, top_k), lambda i: (i, 0)),
                   pl.BlockSpec((tm, top_k), lambda i: (i, 0))),
        compiler_params=pltpu.CompilerParams(
            dimension_semantics=("parallel",),
            vmem_limit_bytes=_VMEM_LIMIT),
    )(xt_f32, gate_w_t)
    return topk_i, topk_w


def routed_experts(xt_f32, topk_idx, topk_weight, wg_t, wu_t, wd_t, *,
                   tm, th=None, ti=None):
    """Grouped-GEMM routed experts: only assigned (token, expert) rows are
    multiplied; routing weights are applied inside the kernel epilogue."""
    T, H = xt_f32.shape
    E, _, I = wg_t.shape
    K = topk_idx.shape[1]
    th = _pick_tile(H, 512) if th is None else th
    ti = _pick_tile(I, 512) if ti is None else ti
    assert H % th == 0 and (th == H or th % 128 == 0)
    assert I % ti == 0 and (ti == I or ti % 128 == 0)
    kh, ki = H // th, I // ti

    # ---- routing glue (plain JAX): sort assignments by expert, pad every
    # expert's group to a multiple of the token block size `tm`.
    n_assign = T * K
    flat_expert = topk_idx.reshape(-1).astype(jnp.int32)              # (T*K,)
    flat_token = jnp.arange(n_assign, dtype=jnp.int32) // K           # (T*K,)
    flat_w = topk_weight.reshape(-1).astype(jnp.float32)

    order = jnp.argsort(flat_expert)
    sorted_expert = flat_expert[order]
    sorted_token = flat_token[order]
    sorted_w = flat_w[order]

    sizes = jnp.bincount(flat_expert, length=E).astype(jnp.int32)
    starts = (jnp.cumsum(sizes) - sizes).astype(jnp.int32)
    padded_sizes = (((sizes + tm - 1) // tm) * tm).astype(jnp.int32)
    padded_starts = (jnp.cumsum(padded_sizes) - padded_sizes).astype(jnp.int32)
    padded_ends = jnp.cumsum(padded_sizes).astype(jnp.int32)

    pad_rows = ((n_assign + E * (tm - 1) + tm - 1) // tm) * tm        # static bound
    nb = pad_rows // tm

    pos_in_group = jnp.arange(n_assign, dtype=jnp.int32) - starts[sorted_expert]
    dest = (padded_starts[sorted_expert] + pos_in_group).astype(jnp.int32)

    # Per token-block: owning expert and number of valid (non-pad) rows.
    # Trailing empty blocks repeat the previous expert so the frozen index
    # maps issue no new weight DMAs, and their GEMMs are skipped via pl.when.
    block_start = jnp.arange(nb, dtype=jnp.int32) * tm
    be_raw = jnp.minimum(
        jnp.searchsorted(padded_ends, block_start, side="right"),
        E - 1).astype(jnp.int32)
    data_end = padded_starts + sizes
    block_valid = jnp.clip(data_end[be_raw] - block_start, 0, tm).astype(jnp.int32)
    be_last = jnp.max(jnp.where(block_valid > 0, be_raw, 0)).astype(jnp.int32)
    block_expert = jnp.where(block_valid > 0, be_raw, be_last).astype(jnp.int32)

    # TODO(synk): gather x rows inside the kernel (manual DMA driven by a
    # prefetched sorted_token table) to avoid materializing x_sorted in HBM.
    x_sorted = jnp.zeros((pad_rows, H), jnp.bfloat16).at[dest].set(
        xt_f32[sorted_token].astype(jnp.bfloat16))
    w_sorted = jnp.zeros((pad_rows, 1), jnp.float32).at[dest].set(sorted_w[:, None])

    def w_map(b, i, k, be, nr):
        return (b, 0)

    def x_map(b, i, k, be, nr):
        return (b, jnp.where(nr[b] > 0, k, 0))

    def wgu_map(b, i, k, be, nr):
        v = nr[b] > 0
        return (be[b], jnp.where(v, k, kh - 1), jnp.where(v, i, ki - 1))

    def wd_map(b, i, k, be, nr):
        return (be[b], jnp.where(nr[b] > 0, i, ki - 1), 0)

    def o_map(b, i, k, be, nr):
        return (b, 0)

    y_padded = pl.pallas_call(
        grouped_expert_kernel,
        out_shape=jax.ShapeDtypeStruct((pad_rows, H), jnp.bfloat16),
        grid_spec=pltpu.PrefetchScalarGridSpec(
            num_scalar_prefetch=2,
            grid=(nb, ki, kh),
            in_specs=[
                pl.BlockSpec((tm, 1), w_map),          # routing weights
                pl.BlockSpec((tm, th), x_map),         # sorted tokens
                pl.BlockSpec((1, th, ti), wgu_map),    # gate proj tile
                pl.BlockSpec((1, th, ti), wgu_map),    # up proj tile
                pl.BlockSpec((1, ti, H), wd_map),      # down proj tile
            ],
            out_specs=pl.BlockSpec((tm, H), o_map),
            scratch_shapes=[pltpu.VMEM((tm, ti), jnp.float32),
                            pltpu.VMEM((tm, ti), jnp.float32),
                            pltpu.VMEM((tm, H), jnp.float32)],
        ),
        compiler_params=pltpu.CompilerParams(
            dimension_semantics=("parallel", "arbitrary", "arbitrary"),
            vmem_limit_bytes=_VMEM_LIMIT),
        # TODO(synk): pipeline_mode=pl.Buffered(3) on the wg/wu specs once
        # th/ti are tuned per generation (v6e: th~1024, v7x: th<=512).
    )(block_expert, block_valid, w_sorted, x_sorted, wg_t, wu_t, wd_t)

    # Scatter-add back to token order (weights already applied in-kernel).
    routed = jnp.zeros((T, H), jnp.float32).at[sorted_token].add(
        y_padded[dest].astype(jnp.float32))
    return routed


def shared_experts_mlp(xt_bf16, swg_t, swu_t, swd_t, *, tm, tsi=None):
    Tp, H = xt_bf16.shape
    SI = swg_t.shape[1]
    tsi = _pick_tile(SI, 512) if tsi is None else tsi
    assert Tp % tm == 0
    assert SI % tsi == 0 and (tsi == SI or tsi % 128 == 0)
    return pl.pallas_call(
        shared_mlp_kernel,
        out_shape=jax.ShapeDtypeStruct((Tp, H), jnp.bfloat16),
        grid=(Tp // tm, SI // tsi),
        in_specs=[pl.BlockSpec((tm, H), lambda i, j: (i, 0)),
                  pl.BlockSpec((H, tsi), lambda i, j: (0, j)),
                  pl.BlockSpec((H, tsi), lambda i, j: (0, j)),
                  pl.BlockSpec((tsi, H), lambda i, j: (j, 0))],
        out_specs=pl.BlockSpec((tm, H), lambda i, j: (i, 0)),
        scratch_shapes=[pltpu.VMEM((tm, H), jnp.float32)],
        compiler_params=pltpu.CompilerParams(
            dimension_semantics=("parallel", "arbitrary"),
            vmem_limit_bytes=_VMEM_LIMIT),
    )(xt_bf16, swg_t, swu_t, swd_t)


def deepseek_v2_moe_forward(x, prep, *, top_k, routed_scaling_factor,
                            tm_tok=128, tm_group=128, th=None, ti=None, tsi=None):
    """x: (B, S, H) float32 -> ((B, S, H) float32, (topk_idx, topk_weight)).
    tm_tok / tm_group = 128 suits v5e; use 256 on v6e / v7x."""
    B, S, H = x.shape
    T = B * S
    xt = x.reshape(T, H).astype(jnp.float32)

    # Explicit token padding to the tile multiple (no T % tm requirement).
    T_pad = ((T + tm_tok - 1) // tm_tok) * tm_tok
    xt_pad = jnp.pad(xt, ((0, T_pad - T), (0, 0)))

    topk_idx_p, topk_weight_p = deepseek_v2_moe_gate(
        xt_pad, prep["gate_w_t"], top_k=top_k,
        routed_scaling_factor=routed_scaling_factor, tm=tm_tok)
    topk_idx, topk_weight = topk_idx_p[:T], topk_weight_p[:T]

    routed = routed_experts(xt, topk_idx, topk_weight,
                            prep["wg_t"], prep["wu_t"], prep["wd_t"],
                            tm=tm_group, th=th, ti=ti)

    shared = shared_experts_mlp(xt_pad.astype(jnp.bfloat16),
                                prep["swg_t"], prep["swu_t"], prep["swd_t"],
                                tm=tm_tok, tsi=tsi)[:T]

    out = (routed + shared.astype(jnp.float32)).reshape(B, S, H)
    return out, (topk_idx, topk_weight)


# ------------------------------------------------------------------ reference

def ref_forward(x, params, *, top_k, routed_scaling_factor):
    B, S, H = x.shape
    xt = x.reshape(-1, H).astype(jnp.float32)
    E = params["gate_w"].shape[0]
    logits = xt @ params["gate_w"].T
    scores = jax.nn.softmax(logits, axis=-1)
    vals, idx = jax.lax.top_k(scores, top_k)
    vals = vals * routed_scaling_factor
    out = jnp.zeros_like(xt)
    for e in range(E):
        w_e = jnp.where(idx == e, vals, 0.0).sum(-1)
        h = jax.nn.silu(xt @ params["wg"][e].T) * (xt @ params["wu"][e].T)
        out = out + w_e[:, None] * (h @ params["wd"][e].T)
    sh = jax.nn.silu(xt @ params["swg"].T) * (xt @ params["swu"].T)
    shared = sh @ params["swd"].T
    return (out + shared).reshape(B, S, H), (idx, vals)


# ----------------------------------------------------------------------- main

if __name__ == "__main__":
    # small DeepseekV2 MoE configuration
    B, S = 2, 8
    H = 32                    # hidden_size
    I = 16                    # moe_intermediate_size
    E = 8                     # n_routed_experts
    TOP_K = 2                 # num_experts_per_tok
    N_SHARED = 2              # n_shared_experts
    SI = I * N_SHARED         # shared experts intermediate
    ROUTED_SCALE = 1.0        # routed_scaling_factor

    key = jax.random.PRNGKey(0)
    ks = jax.random.split(key, 8)
    init = lambda k, shape: (0.02 * jax.random.normal(k, shape)).astype(jnp.float32)

    params = {
        "gate_w": init(ks[0], (E, H)),        # DeepseekV2MoEGate.weight  (E, H)
        "wg": init(ks[1], (E, I, H)),         # experts[e].gate_proj.weight
        "wu": init(ks[2], (E, I, H)),         # experts[e].up_proj.weight
        "wd": init(ks[3], (E, H, I)),         # experts[e].down_proj.weight
        "swg": init(ks[4], (SI, H)),          # shared_experts.gate_proj.weight
        "swu": init(ks[5], (SI, H)),          # shared_experts.up_proj.weight
        "swd": init(ks[6], (H, SI)),          # shared_experts.down_proj.weight
    }
    x = jax.random.normal(ks[7], (B, S, H), dtype=jnp.float32)

    prep = prepare_params(params)             # one-time layout/dtype prep

    out, (topk_idx, topk_weight) = deepseek_v2_moe_forward(
        x, prep, top_k=TOP_K, routed_scaling_factor=ROUTED_SCALE,
        tm_tok=128, tm_group=128)
    out = jax.block_until_ready(out)

    ref_out, (ref_idx, ref_w) = ref_forward(
        x, params, top_k=TOP_K, routed_scaling_factor=ROUTED_SCALE)

    assert out.shape == (B, S, H)
    assert topk_idx.shape == (B * S, TOP_K)
    assert topk_weight.shape == (B * S, TOP_K)
    assert jnp.allclose(jnp.sort(topk_weight, axis=-1),
                        jnp.sort(ref_w, axis=-1), atol=1e-3, rtol=1e-3)
    assert jnp.allclose(out, ref_out, atol=2e-3, rtol=2e-2)

    print("KERNEL_OK")
</pallas_src>

<mosaic_0001>
module attributes {stable_mosaic.version = 11 : i64} {
  func.func @gate_topk_kernel(%arg0: i32, %arg1: memref<128x32xf32, #tpu.memory_space<vmem>>, %arg2: memref<32x8xf32, #tpu.memory_space<vmem>>, %arg3: memref<128x2xf32, #tpu.memory_space<vmem>>, %arg4: memref<128x2xi32, #tpu.memory_space<vmem>>) attributes {dimension_semantics = [#tpu.dimension_semantics<parallel>], iteration_bounds = array<i64: 1>, scalar_prefetch = 0 : i64, scratch_operands = 0 : i64, tpu.core_type = #tpu.core_type<tc>, window_params = [{transform_indices = @transform_0, window_bounds = array<i64: 128, 32>}, {pipeline_mode = #tpu.pipeline_mode<synchronous>, transform_indices = @transform_1, window_bounds = array<i64: 32, 8>}, {transform_indices = @transform_2, window_bounds = array<i64: 128, 2>}, {transform_indices = @transform_3, window_bounds = array<i64: 128, 2>}]} {
    %c0 = arith.constant 0 : index
    %c0_0 = arith.constant 0 : index
    %0 = vector.load %arg1[%c0, %c0_0] : memref<128x32xf32, #tpu.memory_space<vmem>>, vector<128x32xf32>
    %c0_1 = arith.constant 0 : index
    %c0_2 = arith.constant 0 : index
    %1 = vector.load %arg2[%c0_1, %c0_2] : memref<32x8xf32, #tpu.memory_space<vmem>>, vector<32x8xf32>
    %cst = arith.constant dense<0.000000e+00> : vector<128x8xf32>
    %2 = tpu.matmul %0, %1, %cst {dimension_numbers = #tpu.dot_dimension_numbers<[1], [0], [0], [1], [0, 0, 1, 1], [], []>} : vector<128x32xf32>, vector<32x8xf32>, vector<128x8xf32> -> vector<128x8xf32>
    %cst_3 = arith.constant dense<0xFF800000> : vector<128xf32>
    %3 = vector.multi_reduction <maximumf>, %2, %cst_3 [1] : vector<128x8xf32> to vector<128xf32>
    %4 = vector.shape_cast %3 : vector<128xf32> to vector<128x1xf32>
    %5 = vector.broadcast %4 : vector<128x1xf32> to vector<128x8xf32>
    %6 = arith.subf %2, %5 : vector<128x8xf32>
    %7 = math.exp %6 : vector<128x8xf32>
    %cst_4 = arith.constant dense<0.000000e+00> : vector<128xf32>
    %8 = vector.multi_reduction <add>, %7, %cst_4 [1] : vector<128x8xf32> to vector<128xf32>
    %9 = vector.shape_cast %8 : vector<128xf32> to vector<128x1xf32>
    %10 = vector.broadcast %9 : vector<128x1xf32> to vector<128x8xf32>
    %11 = arith.divf %7, %10 : vector<128x8xf32>
    %12 = tpu.iota {dimensions = array<i32: 1>} : vector<128x8xi32>
    %13 = tpu.iota {dimensions = array<i32: 1>} : vector<128x2xi32>
    %cst_5 = arith.constant 0.000000e+00 : f32
    %14 = vector.broadcast %cst_5 : f32 to vector<128x2xf32>
    %c0_i32 = arith.constant 0 : i32
    %15 = vector.broadcast %c0_i32 : i32 to vector<128x2xi32>
    %cst_6 = arith.constant dense<0xFF800000> : vector<128xf32>
    %16 = vector.multi_reduction <maximumf>, %11, %cst_6 [1] : vector<128x8xf32> to vector<128xf32>
    %17 = vector.shape_cast %16 : vector<128xf32> to vector<128x1xf32>
    %18 = vector.broadcast %17 : vector<128x1xf32> to vector<128x8xf32>
    %19 = arith.cmpf oeq, %11, %18 : vector<128x8xf32>
    %c8_i32 = arith.constant 8 : i32
    %20 = vector.broadcast %c8_i32 : i32 to vector<128x8xi32>
    %21 = arith.select %19, %12, %20 : vector<128x8xi1>, vector<128x8xi32>
    %cst_7 = arith.constant dense<2147483647> : vector<128xi32>
    %22 = vector.multi_reduction <minsi>, %21, %cst_7 [1] : vector<128x8xi32> to vector<128xi32>
    %23 = vector.shape_cast %22 : vector<128xi32> to vector<128x1xi32>
    %c0_i32_8 = arith.constant 0 : i32
    %24 = vector.broadcast %c0_i32_8 : i32 to vector<128x2xi32>
    %25 = arith.cmpi eq, %13, %24 : vector<128x2xi32>
    %26 = vector.shape_cast %17 : vector<128x1xf32> to vector<128x1xf32>
    %27 = vector.broadcast %26 : vector<128x1xf32> to vector<128x2xf32>
    %28 = arith.select %25, %27, %14 : vector<128x2xi1>, vector<128x2xf32>
    %c0_i32_9 = arith.constant 0 : i32
    %29 = vector.broadcast %c0_i32_9 : i32 to vector<128x2xi32>
    %30 = arith.cmpi eq, %13, %29 : vector<128x2xi32>
    %31 = vector.shape_cast %23 : vector<128x1xi32> to vector<128x1xi32>
    %32 = vector.broadcast %31 : vector<128x1xi32> to vector<128x2xi32>
    %33 = arith.select %30, %32, %15 : vector<128x2xi1>, vector<128x2xi32>
    %34 = vector.broadcast %23 : vector<128x1xi32> to vector<128x8xi32>
    %35 = arith.cmpi eq, %12, %34 : vector<128x8xi32>
    %cst_10 = arith.constant -1.000000e+00 : f32
    %36 = vector.broadcast %cst_10 : f32 to vector<128x8xf32>
    %37 = arith.select %35, %36, %11 : vector<128x8xi1>, vector<128x8xf32>
    %cst_11 = arith.constant dense<0xFF800000> : vector<128xf32>
    %38 = vector.multi_reduction <maximumf>, %37, %cst_11 [1] : vector<128x8xf32> to vector<128xf32>
    %39 = vector.shape_cast %38 : vector<128xf32> to vector<128x1xf32>
    %40 = vector.broadcast %39 : vector<128x1xf32> to vector<128x8xf32>
    %41 = arith.cmpf oeq, %37, %40 : vector<128x8xf32>
    %c8_i32_12 = arith.constant 8 : i32
    %42 = vector.broadcast %c8_i32_12 : i32 to vector<128x8xi32>
    %43 = arith.select %41, %12, %42 : vector<128x8xi1>, vector<128x8xi32>
    %cst_13 = arith.constant dense<2147483647> : vector<128xi32>
    %44 = vector.multi_reduction <minsi>, %43, %cst_13 [1] : vector<128x8xi32> to vector<128xi32>
    %45 = vector.shape_cast %44 : vector<128xi32> to vector<128x1xi32>
    %c1_i32 = arith.constant 1 : i32
    %46 = vector.broadcast %c1_i32 : i32 to vector<128x2xi32>
    %47 = arith.cmpi eq, %13, %46 : vector<128x2xi32>
    %48 = vector.shape_cast %39 : vector<128x1xf32> to vector<128x1xf32>
    %49 = vector.broadcast %48 : vector<128x1xf32> to vector<128x2xf32>
    %50 = arith.select %47, %49, %28 : vector<128x2xi1>, vector<128x2xf32>
    %c1_i32_14 = arith.constant 1 : i32
    %51 = vector.broadcast %c1_i32_14 : i32 to vector<128x2xi32>
    %52 = arith.cmpi eq, %13, %51 : vector<128x2xi32>
    %53 = vector.shape_cast %45 : vector<128x1xi32> to vector<128x1xi32>
    %54 = vector.broadcast %53 : vector<128x1xi32> to vector<128x2xi32>
    %55 = arith.select %52, %54, %33 : vector<128x2xi1>, vector<128x2xi32>
    %cst_15 = arith.constant 1.000000e+00 : f32
    %56 = vector.broadcast %cst_15 : f32 to vector<128x2xf32>
    %57 = arith.mulf %50, %56 : vector<128x2xf32>
    %c0_16 = arith.constant 0 : index
    %c0_17 = arith.constant 0 : index
    %58 = vector.load %arg3[%c0_16, %c0_17] : memref<128x2xf32, #tpu.memory_space<vmem>>, vector<128x2xf32>
    tpu.vector_store %arg3[%c0_16, %c0_17], %57 {strides = array<i32>} : memref<128x2xf32, #tpu.memory_space<vmem>>, vector<128x2xf32>,
    %c0_18 = arith.constant 0 : index
    %c0_19 = arith.constant 0 : index
    %59 = vector.load %arg4[%c0_18, %c0_19] : memref<128x2xi32, #tpu.memory_space<vmem>>, vector<128x2xi32>
    tpu.vector_store %arg4[%c0_18, %c0_19], %55 {strides = array<i32>} : memref<128x2xi32, #tpu.memory_space<vmem>>, vector<128x2xi32>,
    return
  }
  func.func @transform_0(%arg0: i32) -> (i32, i32) {
    %c0_i32 = arith.constant 0 : i32
    %c0_i32_0 = arith.constant 0 : i32
    return %arg0, %c0_i32 : i32, i32
  }
  func.func @transform_1(%arg0: i32) -> (i32, i32) {
    %c0_i32 = arith.constant 0 : i32
    %c0_i32_0 = arith.constant 0 : i32
    %c0_i32_1 = arith.constant 0 : i32
    return %c0_i32, %c0_i32_0 : i32, i32
  }
  func.func @transform_2(%arg0: i32) -> (i32, i32) {
    %c0_i32 = arith.constant 0 : i32
    %c0_i32_0 = arith.constant 0 : i32
    return %arg0, %c0_i32 : i32, i32
  }
  func.func @transform_3(%arg0: i32) -> (i32, i32) {
    %c0_i32 = arith.constant 0 : i32
    %c0_i32_0 = arith.constant 0 : i32
    return %arg0, %c0_i32 : i32, i32
  }
}

</mosaic_0001>

<bundles_post_ra>
// kernel: tpu_custom_call.1
= control target key start
LH: loop header
LB: loop body
LE: loop exit
PB: predicated region body
PF: predicated region fallthrough
CT: control target
= control target key end

     0   :  { %vm33_vm0 = vcmask 261120   ;;  %vm227_vm1 = vcmask 64512   ;;  %s2577_s1 = inlined_call_operand.vmem [shape: f32[32,8], index: 1, kind: input, shape index: {}]   ;;  %s2578_s0 = inlined_call_operand.vmem [shape: f32[128,32], index: 0, kind: input, shape index: {}]   ;;  %s2579_s2 = inlined_call_operand.vmem [shape: f32[128,2], index: 2, kind: output, shape index: {0}]   ;;  %s2580_s3 = inlined_call_operand.vmem [shape: s32[128,2], index: 3, kind: output, shape index: {1}]  }
   0x1   :  { %v32_v0 = vld [vmem:[%s2577_s1 + $0x18] sm:$0xff]  ;;  %v31_v1 = vld [vmem:[%s2577_s1 + $0x10] sm:$0xff]  ;;  %v30_v2 = vld [vmem:[%s2577_s1 + $0x8] sm:$0xff] }
   0x2   :  { %1221 = vmatprep.subr.mxu0 %v32_v0  ;;  %1253 = vmatprep.subr.mxu1 %v32_v0  ;;  %v29_v3 = vld [vmem:[%s2577_s1] sm:$0xff]  ;;  %v14_v6 = vld [vmem:[%s2578_s0 + $0x8] sm:$0xff]  ;;  %v15_v8 = vld [vmem:[%s2578_s0 + $0x10] sm:$0xff] }
   0x3   :  { %1222 = vmatpush3.msra.mxu0 %v32_v0  ;;  %1257 = vmatpush3.msra.mxu1 %v32_v0  ;;  %v13_v4 = vld [vmem:[%s2578_s0] sm:$0xff]  ;;  %v22_v7 = vld [vmem:[%s2578_s0 + $0x48] sm:$0xff]  ;;  %v23_v9 = vld [vmem:[%s2578_s0 + $0x50] sm:$0xff] }
   0x4   :  { %1223 = vmatprep.subr.mxu0 %v31_v1  ;;  %1254 = vmatprep.subr.mxu1 %v31_v1  ;;  %v21_v5 = vld [vmem:[%s2578_s0 + $0x40] sm:$0xff]  ;;  %v16_v10 = vld [vmem:[%s2578_s0 + $0x18] sm:$0xff]  ;;  %v18_v14 = vld [vmem:[%s2578_s0 + $0x28] sm:$0xff] }
   0x5   :  { %1224 = vmatpush3.msra.mxu0 %v31_v1  ;;  %1258 = vmatpush3.msra.mxu1 %v31_v1  ;;  %v24_v11 = vld [vmem:[%s2578_s0 + $0x58] sm:$0xff]  ;;  %v17_v12 = vld [vmem:[%s2578_s0 + $0x20] sm:$0xff]  ;;  %v26_v15 = vld [vmem:[%s2578_s0 + $0x68] sm:$0xff] }
   0x6   :  { %1225 = vmatprep.subr.mxu0 %v30_v2  ;;  %1255 = vmatprep.subr.mxu1 %v30_v2  ;;  %v25_v13 = vld [vmem:[%s2578_s0 + $0x60] sm:$0xff]  ;;  %v19_v16 = vld [vmem:[%s2578_s0 + $0x30] sm:$0xff]  ;;  %v20_v18 = vld [vmem:[%s2578_s0 + $0x38] sm:$0xff] }
   0x7   :  { %1226 = vmatpush3.msra.mxu0 %v30_v2  ;;  %1259 = vmatpush3.msra.mxu1 %v30_v2  ;;  %v27_v17 = vld [vmem:[%s2578_s0 + $0x70] sm:$0xff]  ;;  %v28_v19 = vld [vmem:[%s2578_s0 + $0x78] sm:$0xff] }
   0x8   :  { %1227 = vmatprep.subr.mxu0 %v29_v3  ;;  %1256 = vmatprep.subr.mxu1 %v29_v3 }
   0x9   :  { %1228 = vmatpush3.msra.mxu0 %v29_v3  ;;  %1260 = vmatpush3.msra.mxu1 %v29_v3 }
   0xa   :  { %1229 = vmatprep.mubr.msk.f32.mxu0 %vm33_vm0, %v13_v4  ;;  %1241 = vmatprep.mubr.msk.f32.mxu1 %vm33_vm0, %v21_v5 }
   0xb   :  { %1230 = vmatmul.mubr.msk.f32.vlgmr.msra.gmra.mxu0 %vm33_vm0, %v14_v6  ;;  %1242 = vmatmul.mubr.msk.f32.vlgmr.msra.gmra.mxu1 %vm33_vm0, %v22_v7 }
   0xc   :  { %1232 = vmatprep.mubr.msk.f32.mxu0 %vm33_vm0, %v15_v8  ;;  %1244 = vmatprep.mubr.msk.f32.mxu1 %vm33_vm0, %v23_v9 }
   0xf   :  { %1233 = vmatmul.mubr.msk.f32.gmra.mxu0 %vm33_vm0, %v16_v10  ;;  %1245 = vmatmul.mubr.msk.f32.gmra.mxu1 %vm33_vm0, %v24_v11 }
  0x10   :  { %1235 = vmatprep.mubr.msk.f32.mxu0 %vm33_vm0, %v17_v12  ;;  %1247 = vmatprep.mubr.msk.f32.mxu1 %vm33_vm0, %v25_v13 }
  0x13   :  { %1236 = vmatmul.mubr.msk.f32.gmra.mxu0 %vm33_vm0, %v18_v14  ;;  %1248 = vmatmul.mubr.msk.f32.gmra.mxu1 %vm33_vm0, %v26_v15 }
  0x14   :  { %1238 = vmatprep.mubr.msk.f32.mxu0 %vm33_vm0, %v19_v16  ;;  %1250 = vmatprep.mubr.msk.f32.mxu1 %vm33_vm0, %v27_v17 }
  0x17   :  { %1239 = vmatmul.mubr.msk.f32.gmra.mxu0 %vm33_vm0, %v20_v18  ;;  %1251 = vmatmul.mubr.msk.f32.gmra.mxu1 %vm33_vm0, %v28_v19 }
  0xcb   :  { %v1231_v20 = vpop.f32.mrf.mxu0  ;;  %v1243_v21 = vpop.f32.mrf.mxu1 }
  0xcc   :  { %v255_v22 = vsel %vm227_vm1, %v1243_v21, -inf  ;;  %v231_v23 = vsel %vm227_vm1, %v1231_v20, -inf }
  0xcd   :  { %256 = vmax.xlane.f32.xlu1 %v255_v22  ;;  %232 = vmax.xlane.f32.xlu0 %v231_v23  ;;  %v148_v24 = vpop.f32.mrf.mxu0  ;;  %v188_v25 = vpop.f32.mrf.mxu1 }
  0xce   :  { %v228_v27 = vsel %vm227_vm1, %v148_v24, -inf  ;;  %v252_v33 = vsel %vm227_vm1, %v188_v25, -inf }
  0xcf   :  { %v1234_v26 = vpop.f32.mrf.mxu0  ;;  %v1246_v29 = vpop.f32.mrf.mxu1 }
  0xd0   :  { %v237_v28 = vsel %vm227_vm1, %v1234_v26, -inf  ;;  %v261_v31 = vsel %vm227_vm1, %v1246_v29, -inf }
  0xd1   :  { %229 = vmax.xlane.f32.xlu0 %v228_v27  ;;  %238 = vmax.xlane.f32.xlu1 %v237_v28  ;;  %v158_v30 = vpop.f32.mrf.mxu0  ;;  %v198_v34 = vpop.f32.mrf.mxu1 }
  0xd2   :  { %v258_v37 = vsel %vm227_vm1, %v198_v34, -inf  ;;  %v234_v38 = vsel %vm227_vm1, %v158_v30, -inf }
  0xd3   :  { %v1426_v32 = vpop.f32.mrf.mxu0  ;;  %v1431_v36 = vpop.f32.mrf.mxu1 }
  0xd4   :  { %v243_v39 = vsel %vm227_vm1, %v1426_v32, -inf  ;;  %v267_v43 = vsel %vm227_vm1, %v1431_v36, -inf }
  0xd5   :  { %253 = vmax.xlane.f32.xlu0 %v252_v33  ;;  %262 = vmax.xlane.f32.xlu1 %v261_v31  ;;  %v1429_v35 = vpop.f32.mrf.mxu0  ;;  %v1439_v41 = vpop.f32.mrf.mxu1 }
  0xd6   :  { %v240_v40 = vsel %vm227_vm1, %v1429_v35, -inf  ;;  %v264_v44 = vsel %vm227_vm1, %v1439_v41, -inf }
  0xd7   :  { %v1441_v42 = vpop.f32.mrf.mxu0  ;;  %v1449_v46 = vpop.f32.mrf.mxu1 }
  0xd8   :  { %v249_v47 = vsel %vm227_vm1, %v1441_v42, -inf  ;;  %v273_v50 = vsel %vm227_vm1, %v1449_v46, -inf }
  0xd9   :  { %259 = vmax.xlane.f32.xlu0 %v258_v37  ;;  %235 = vmax.xlane.f32.xlu1 %v234_v38  ;;  %v1447_v45 = vpop.f32.mrf.mxu0  ;;  %v1455_v49 = vpop.f32.mrf.mxu1 }
  0xda   :  { %v246_v48 = vsel %vm227_vm1, %v1447_v45, -inf  ;;  %v270_v51 = vsel %vm227_vm1, %v1455_v49, -inf }
  0xdd   :  { %244 = vmax.xlane.f32.xlu1 %v243_v39  ;;  %241 = vmax.xlane.f32.xlu0 %v240_v40 }
  0xe1   :  { %268 = vmax.xlane.f32.xlu1 %v267_v43  ;;  %265 = vmax.xlane.f32.xlu0 %v264_v44 }
  0xe5   :  { %250 = vmax.xlane.f32.xlu1 %v249_v47  ;;  %247 = vmax.xlane.f32.xlu0 %v246_v48 }
  0xe9   :  { %274 = vmax.xlane.f32.xlu1 %v273_v50  ;;  %271 = vmax.xlane.f32.xlu0 %v270_v51 }
 0x156   :  { %v257_v52 = vpop.xlane.xlu1 %256  ;;  %v233_v53 = vpop.xlane.xlu0 %232 }
 0x157   :  { %v285_v54 = vsub.f32 %v1243_v21, %v257_v52  ;;  %v277_v55 = vsub.f32 %v1231_v20, %v233_v53 }
 0x159   :  { %v294_v56 = vmul.f32 1.442695, %v277_v55  ;;  %v310_v57 = vmul.f32 1.442695, %v285_v54 }
 0x15a   :  { %v230_v58 = vpop.xlane.xlu0 %229  ;;  %v239_v59 = vpop.xlane.xlu1 %238 }
 0x15b   :  { %v276_v60 = vsub.f32 %v148_v24, %v230_v58  ;;  %v279_v61 = vsub.f32 %v1234_v26, %v239_v59  ;;  %1261 = vpow2.f32 %v294_v56 }
 0x15c   :  { %1263 = vpow2.f32 %v310_v57 }
 0x15d   :  { %v292_v62 = vmul.f32 1.442695, %v276_v60  ;;  %v298_v63 = vmul.f32 1.442695, %v279_v61 }
 0x15e   :  { %v254_v0 = vpop.xlane.xlu0 %253  ;;  %v263_v1 = vpop.xlane.xlu1 %262 }
 0x15f   :  { %1265 = vpow2.f32 %v292_v62  ;;  %v284_v2 = vsub.f32 %v188_v25, %v254_v0  ;;  %v287_v3 = vsub.f32 %v1246_v29, %v263_v1 }
 0x160   :  { %1267 = vpow2.f32 %v298_v63 }
 0x161   :  { %v308_v4 = vmul.f32 1.442695, %v284_v2  ;;  %v314_v5 = vmul.f32 1.442695, %v287_v3 }
 0x162   :  { %v260_v6 = vpop.xlane.xlu0 %259  ;;  %v236_v7 = vpop.xlane.xlu1 %235 }
 0x163   :  { %1269 = vpow2.f32 %v308_v4  ;;  %v286_v8 = vsub.f32 %v198_v34, %v260_v6  ;;  %v278_v9 = vsub.f32 %v158_v30, %v236_v7 }
 0x164   :  { %1271 = vpow2.f32 %v314_v5 }
 0x165   :  { %v296_v10 = vmul.f32 1.442695, %v278_v9  ;;  %v312_v11 = vmul.f32 1.442695, %v286_v8 }
 0x166   :  { %v245_v12 = vpop.xlane.xlu1 %244  ;;  %v242_v13 = vpop.xlane.xlu0 %241 }
 0x167   :  { %v281_v14 = vsub.f32 %v1426_v32, %v245_v12  ;;  %v280_v15 = vsub.f32 %v1429_v35, %v242_v13  ;;  %1273 = vpow2.f32 %v296_v10 }
 0x168   :  { %v1463_v16 = vpop.eup %1261  ;;  %1275 = vpow2.f32 %v312_v11 }
 0x169   :  { %v302_v17 = vmul.f32 1.442695, %v281_v14  ;;  %v300_v18 = vmul.f32 1.442695, %v280_v15  ;;  %v327_v21 = vsel %vm227_vm1, %v1463_v16, 0.0  ;;  %v1467_v22 = vpop.eup %1263 }
 0x16a   :  { %v269_v19 = vpop.xlane.xlu1 %268  ;;  %v266_v20 = vpop.xlane.xlu0 %265  ;;  %328 = vadd.xlane.f32.xlu1 %v327_v21  ;;  %v351_v29 = vsel %vm227_vm1, %v1467_v22, 0.0 }
 0x16b   :  { %1277 = vpow2.f32 %v302_v17  ;;  %v289_v23 = vsub.f32 %v1431_v36, %v269_v19  ;;  %v288_v24 = vsub.f32 %v1439_v41, %v266_v20 }
 0x16c   :  { %v1471_v25 = vpop.eup %1265  ;;  %1279 = vpow2.f32 %v300_v18 }
 0x16d   :  { %v318_v26 = vmul.f32 1.442695, %v289_v23  ;;  %v324_v27 = vsel %vm227_vm1, %v1471_v25, 0.0  ;;  %v316_v28 = vmul.f32 1.442695, %v288_v24  ;;  %v1477_v32 = vpop.eup %1267 }
 0x16e   :  { %v251_v30 = vpop.xlane.xlu1 %250  ;;  %325 = vadd.xlane.f32.xlu0 %v324_v27  ;;  %v248_v31 = vpop.xlane.xlu0 %247  ;;  %352 = vadd.xlane.f32.xlu1 %v351_v29  ;;  %v333_v39 = vsel %vm227_vm1, %v1477_v32, 0.0 }
 0x16f   :  { %1281 = vpow2.f32 %v318_v26  ;;  %v283_v33 = vsub.f32 %v1441_v42, %v251_v30  ;;  %v282_v34 = vsub.f32 %v1447_v45, %v248_v31 }
 0x170   :  { %v1481_v35 = vpop.eup %1269  ;;  %1283 = vpow2.f32 %v316_v28 }
 0x171   :  { %v306_v36 = vmul.f32 1.442695, %v283_v33  ;;  %v348_v37 = vsel %vm227_vm1, %v1481_v35, 0.0  ;;  %v304_v38 = vmul.f32 1.442695, %v282_v34  ;;  %v1487_v43 = vpop.eup %1271 }
 0x172   :  { %v275_v40 = vpop.xlane.xlu1 %274  ;;  %349 = vadd.xlane.f32.xlu0 %v348_v37  ;;  %v272_v41 = vpop.xlane.xlu0 %271  ;;  %334 = vadd.xlane.f32.xlu1 %v333_v39  ;;  %v357_v50 = vsel %vm227_vm1, %v1487_v43, 0.0 }
 0x173   :  { %1285 = vpow2.f32 %v306_v36  ;;  %v291_v42 = vsub.f32 %v1449_v46, %v275_v40  ;;  %v290_v44 = vsub.f32 %v1455_v49, %v272_v41 }
 0x174   :  { %v1491_v45 = vpop.eup %1273  ;;  %1287 = vpow2.f32 %v304_v38 }
 0x175   :  { %v322_v47 = vmul.f32 1.442695, %v291_v42  ;;  %v320_v48 = vmul.f32 1.442695, %v290_v44  ;;  %v330_v51 = vsel %vm227_vm1, %v1491_v45, 0.0  ;;  %v1497_v52 = vpop.eup %1275 }
 0x176   :  { %358 = vadd.xlane.f32.xlu1 %v357_v50  ;;  %331 = vadd.xlane.f32.xlu0 %v330_v51  ;;  %v354_v49 = vsel %vm227_vm1, %v1497_v52, 0.0 }
 0x177   :  { %1289 = vpow2.f32 %v322_v47 }
 0x178   :  { %v1499_v53 = vpop.eup %1277  ;;  %1291 = vpow2.f32 %v320_v48 }
 0x179   :  { %v339_v46 = vsel %vm227_vm1, %v1499_v53, 0.0  ;;  %v1505_v54 = vpop.eup %1279 }
 0x17a   :  { %340 = vadd.xlane.f32.xlu1 %v339_v46  ;;  %355 = vadd.xlane.f32.xlu0 %v354_v49  ;;  %v336_v57 = vsel %vm227_vm1, %v1505_v54, 0.0 }
 0x17c   :  { %v1507_v55 = vpop.eup %1281 }
 0x17d   :  { %v363_v56 = vsel %vm227_vm1, %v1507_v55, 0.0  ;;  %v1513_v58 = vpop.eup %1283 }
 0x17e   :  { %364 = vadd.xlane.f32.xlu1 %v363_v56  ;;  %337 = vadd.xlane.f32.xlu0 %v336_v57  ;;  %v360_v61 = vsel %vm227_vm1, %v1513_v58, 0.0 }
 0x180   :  { %v1515_v59 = vpop.eup %1285 }
 0x181   :  { %v345_v60 = vsel %vm227_vm1, %v1515_v59, 0.0  ;;  %v1521_v62 = vpop.eup %1287 }
 0x182   :  { %346 = vadd.xlane.f32.xlu1 %v345_v60  ;;  %361 = vadd.xlane.f32.xlu0 %v360_v61  ;;  %v342_v1 = vsel %vm227_vm1, %v1521_v62, 0.0 }
 0x184   :  { %v1523_v63 = vpop.eup %1289 }
 0x185   :  { %v369_v0 = vsel %vm227_vm1, %v1523_v63, 0.0  ;;  %v1529_v2 = vpop.eup %1291 }
 0x186   :  { %370 = vadd.xlane.f32.xlu1 %v369_v0  ;;  %343 = vadd.xlane.f32.xlu0 %v342_v1  ;;  %v366_v3 = vsel %vm227_vm1, %v1529_v2, 0.0 }
 0x18a   :  { %367 = vadd.xlane.f32.xlu0 %v366_v3 }
 0x1f3   :  { %v329_v4 = vpop.xlane.xlu1 %328 }
 0x1f4   :  { %1293 = vrcp.f32 %v329_v4 }
 0x1f7   :  { %v326_v5 = vpop.xlane.xlu0 %325  ;;  %v353_v6 = vpop.xlane.xlu1 %352 }
 0x1f8   :  { %1295 = vrcp.f32 %v326_v5 }
 0x1f9   :  { %1297 = vrcp.f32 %v353_v6 }
 0x1fb   :  { %v350_v7 = vpop.xlane.xlu0 %349  ;;  %v335_v8 = vpop.xlane.xlu1 %334 }
 0x1fc   :  { %1299 = vrcp.f32 %v350_v7 }
 0x1fd   :  { %1301 = vrcp.f32 %v335_v8 }
 0x1ff   :  { %v359_v9 = vpop.xlane.xlu1 %358  ;;  %v332_v10 = vpop.xlane.xlu0 %331 }
 0x200   :  { %1303 = vrcp.f32 %v359_v9 }
 0x201   :  { %v1294_v11 = vpop.eup %1293  ;;  %1305 = vrcp.f32 %v332_v10 }
 0x202   :  { %v1534_v12 = vmul.f32 %v1294_v11, %v1463_v16 }
 0x203   :  { %v341_v13 = vpop.xlane.xlu1 %340  ;;  %v356_v14 = vpop.xlane.xlu0 %355 }
 0x204   :  { %1307 = vrcp.f32 %v341_v13  ;;  %v409_v17 = vsel %vm227_vm1, %v1534_v12, -inf }
 0x205   :  { %v1296_v15 = vpop.eup %1295  ;;  %1309 = vrcp.f32 %v356_v14  ;;  %410 = vmax.xlane.f32.xlu1 %v409_v17 }
 0x206   :  { %v1298_v18 = vpop.eup %1297  ;;  %v1539_v19 = vmul.f32 %v1296_v15, %v1471_v25 }
 0x207   :  { %v1542_v20 = vmul.f32 %v1298_v18, %v1467_v22  ;;  %v365_v21 = vpop.xlane.xlu1 %364  ;;  %v338_v23 = vpop.xlane.xlu0 %337 }
 0x208   :  { %v406_v16 = vsel %vm227_vm1, %v1539_v19, -inf  ;;  %1311 = vrcp.f32 %v365_v21 }
 0x209   :  { %v1300_v24 = vpop.eup %1299  ;;  %v433_v26 = vsel %vm227_vm1, %v1542_v20, -inf  ;;  %407 = vmax.xlane.f32.xlu0 %v406_v16  ;;  %1313 = vrcp.f32 %v338_v23 }
 0x20a   :  { %v1302_v27 = vpop.eup %1301  ;;  %434 = vmax.xlane.f32.xlu1 %v433_v26  ;;  %v1549_v25 = vmul.f32 %v1300_v24, %v1481_v35 }
 0x20b   :  { %v1552_v22 = vmul.f32 %v1302_v27, %v1477_v32  ;;  %v347_v28 = vpop.xlane.xlu1 %346  ;;  %v362_v29 = vpop.xlane.xlu0 %361 }
 0x20c   :  { %v430_v30 = vsel %vm227_vm1, %v1549_v25, -inf  ;;  %1315 = vrcp.f32 %v347_v28 }
 0x20d   :  { %v415_v31 = vsel %vm227_vm1, %v1552_v22, -inf  ;;  %431 = vmax.xlane.f32.xlu0 %v430_v30  ;;  %v1304_v33 = vpop.eup %1303  ;;  %1317 = vrcp.f32 %v362_v29 }
 0x20e   :  { %416 = vmax.xlane.f32.xlu1 %v415_v31  ;;  %v1306_v34 = vpop.eup %1305  ;;  %v1559_v35 = vmul.f32 %v1304_v33, %v1487_v43 }
 0x20f   :  { %v371_v36 = vpop.xlane.xlu1 %370  ;;  %v344_v32 = vpop.xlane.xlu0 %343  ;;  %v1562_v37 = vmul.f32 %v1306_v34, %v1491_v45 }
 0x210   :  { %1319 = vrcp.f32 %v371_v36  ;;  %v439_v38 = vsel %vm227_vm1, %v1559_v35, -inf }
 0x211   :  { %v1308_v39 = vpop.eup %1307  ;;  %1321 = vrcp.f32 %v344_v32  ;;  %v412_v40 = vsel %vm227_vm1, %v1562_v37, -inf }
 0x212   :  { %440 = vmax.xlane.f32.xlu1 %v439_v38  ;;  %v1310_v41 = vpop.eup %1309  ;;  %413 = vmax.xlane.f32.xlu0 %v412_v40  ;;  %v1569_v43 = vmul.f32 %v1308_v39, %v1499_v53 }
 0x213   :  { %v368_v42 = vpop.xlane.xlu0 %367  ;;  %v1572_v44 = vmul.f32 %v1310_v41, %v1497_v52 }
 0x214   :  { %1323 = vrcp.f32 %v368_v42  ;;  %v421_v45 = vsel %vm227_vm1, %v1569_v43, -inf }
 0x215   :  { %v1312_v47 = vpop.eup %1311  ;;  %v436_v48 = vsel %vm227_vm1, %v1572_v44, -inf }
 0x216   :  { %422 = vmax.xlane.f32.xlu1 %v421_v45  ;;  %v1314_v50 = vpop.eup %1313  ;;  %437 = vmax.xlane.f32.xlu0 %v436_v48  ;;  %v1579_v51 = vmul.f32 %v1312_v47, %v1507_v55 }
 0x217   :  { %v1582_v53 = vmul.f32 %v1314_v50, %v1505_v54 }
 0x218   :  { %v445_v52 = vsel %vm227_vm1, %v1579_v51, -inf }
 0x219   :  { %v1316_v46 = vpop.eup %1315  ;;  %v418_v49 = vsel %vm227_vm1, %v1582_v53, -inf }
 0x21a   :  { %446 = vmax.xlane.f32.xlu1 %v445_v52  ;;  %v1318_v56 = vpop.eup %1317  ;;  %419 = vmax.xlane.f32.xlu0 %v418_v49  ;;  %v1589_v57 = vmul.f32 %v1316_v46, %v1515_v59 }
 0x21b   :  { %v1592_v60 = vmul.f32 %v1318_v56, %v1513_v58 }
 0x21c   :  { %v427_v54 = vsel %vm227_vm1, %v1589_v57, -inf }
 0x21d   :  { %v1320_v55 = vpop.eup %1319  ;;  %v442_v61 = vsel %vm227_vm1, %v1592_v60, -inf }
 0x21e   :  { %428 = vmax.xlane.f32.xlu1 %v427_v54  ;;  %v1322_v0 = vpop.eup %1321  ;;  %443 = vmax.xlane.f32.xlu0 %v442_v61  ;;  %v1599_v1 = vmul.f32 %v1320_v55, %v1523_v63  ;;  %v404_v63 = vlaneseq }
 0x21f   :  { %v1602_v3 = vmul.f32 %v1322_v0, %v1521_v62 }
 0x220   :  { %v451_v58 = vsel %vm227_vm1, %v1599_v1, -inf  ;;  %v1613_v7 = vand.u32 127, %v404_v63 }
 0x221   :  { %v1324_v59 = vpop.eup %1323  ;;  %v424_v4 = vsel %vm227_vm1, %v1602_v3, -inf }
 0x222   :  { %452 = vmax.xlane.f32.xlu1 %v451_v58  ;;  %425 = vmax.xlane.f32.xlu0 %v424_v4  ;;  %v1609_v5 = vmul.f32 %v1324_v59, %v1529_v2 }
 0x224   :  { %v448_v6 = vsel %vm227_vm1, %v1609_v5, -inf }
 0x226   :  { %449 = vmax.xlane.f32.xlu0 %v448_v6 }
 0x28e   :  { %v1615_v62 = vpop.xlane.xlu1 %410 }
 0x28f   :  { %vm455_vm2 = vcmp.eq.f32.partialorder %v1534_v12, %v1615_v62 }
 0x290   :  { %v471_v8 = vsel %vm455_vm2, %v1613_v7, 8 }
 0x291   :  { %v1623_v10 = vsel %vm227_vm1, %v471_v8, 2147483647 }
 0x292   :  { %v1620_v9 = vpop.xlane.xlu0 %407  ;;  %v503_v11 = vshra.s32 %v1623_v10, 16 }
 0x293   :  { %v1625_v2 = vpop.xlane.xlu1 %434  ;;  %vm454_vm3 = vcmp.eq.f32.partialorder %v1539_v19, %v1620_v9 }
 0x294   :  { %vm463_vm4 = vcmp.eq.f32.partialorder %v1542_v20, %v1625_v2  ;;  %v470_v13 = vsel %vm454_vm3, %v1613_v7, 8  ;;  %v1634_v15 = vcvt.s32.f32 %v503_v11 }
 0x295   :  { %v479_v14 = vsel %vm463_vm4, %v1613_v7, 8  ;;  %v1637_v17 = vsel %vm227_vm1, %v470_v13, 2147483647 }
 0x296   :  { %v1639_v18 = vpop.xlane.xlu0 %431  ;;  %v1642_v21 = vsel %vm227_vm1, %v479_v14, 2147483647  ;;  %v488_v23 = vshra.s32 %v1637_v17, 16  ;;  %506 = vmin.xlane.f32.xlu1 %v1634_v15 }
 0x297   :  { %v1646_v16 = vpop.xlane.xlu1 %416  ;;  %vm462_vm5 = vcmp.eq.f32.partialorder %v1549_v25, %v1639_v18  ;;  %v623_v24 = vshra.s32 %v1642_v21, 16 }
 0x298   :  { %vm457_vm6 = vcmp.eq.f32.partialorder %v1552_v22, %v1646_v16  ;;  %v478_v26 = vsel %vm462_vm5, %v1613_v7, 8  ;;  %v1654_v27 = vcvt.s32.f32 %v488_v23 }
 0x299   :  { %v473_v28 = vsel %vm457_vm6, %v1613_v7, 8  ;;  %v1657_v29 = vcvt.s32.f32 %v623_v24  ;;  %v1660_v30 = vsel %vm227_vm1, %v478_v26, 2147483647 }
 0x29a   :  { %491 = vmin.xlane.f32.xlu0 %v1654_v27  ;;  %v1664_v31 = vsel %vm227_vm1, %v473_v28, 2147483647  ;;  %v608_v33 = vshra.s32 %v1660_v30, 16 }
 0x29b   :  { %626 = vmin.xlane.f32.xlu1 %v1657_v29  ;;  %v1668_v34 = vpop.xlane.xlu1 %440  ;;  %v533_v36 = vshra.s32 %v1664_v31, 16  ;;  %v1673_v32 = vpop.xlane.xlu0 %413 }
 0x29c   :  { %2592 = vst [vmem:[#allocation2_spill] sm:$0xff] %v1668_v34  ;;  %vm465_vm7 = vcmp.eq.f32.partialorder %v1559_v35, %v1668_v34  ;;  %2593 = vst [vmem:[#allocation3_spill] sm:$0xff] %v1673_v32  ;;  %v1675_v38 = vcvt.s32.f32 %v608_v33  ;;  %vm456_vm8 = vcmp.eq.f32.partialorder %v1562_v37, %v1673_v32  ;;  %v607_v32 = vand.u32 65535, %v1660_v30 }
 0x29d   :  { %v481_v39 = vsel %vm465_vm7, %v1613_v7, 8  ;;  %v1680_v40 = vcvt.s32.f32 %v533_v36  ;;  %v472_v41 = vsel %vm456_vm8, %v1613_v7, 8 }
 0x29e   :  { %611 = vmin.xlane.f32.xlu0 %v1675_v38  ;;  %v1685_v42 = vsel %vm227_vm1, %v481_v39, 2147483647  ;;  %v1692_v48 = vsel %vm227_vm1, %v472_v41, 2147483647 }
 0x29f   :  { %536 = vmin.xlane.f32.xlu1 %v1680_v40  ;;  %v1688_v45 = vpop.xlane.xlu1 %422  ;;  %v653_v47 = vshra.s32 %v1685_v42, 16  ;;  %v1696_v50 = vpop.xlane.xlu0 %437  ;;  %v518_v52 = vshra.s32 %v1692_v48, 16 }
 0x2a0   :  { %2594 = vst [vmem:[#allocation4_spill] sm:$0xff] %v1688_v45  ;;  %vm459_vm9 = vcmp.eq.f32.partialorder %v1569_v43, %v1688_v45  ;;  %2595 = vst [vmem:[#allocation5_spill] sm:$0xff] %v1696_v50  ;;  %vm464_vm10 = vcmp.eq.f32.partialorder %v1572_v44, %v1696_v50  ;;  %v622_v50 = vand.u32 65535, %v1642_v21 }
 0x2a1   :  { %v475_v46 = vsel %vm459_vm9, %v1613_v7, 8  ;;  %v1702_v49 = vcvt.s32.f32 %v653_v47  ;;  %v480_v56 = vsel %vm464_vm10, %v1613_v7, 8  ;;  %v1705_v54 = vcvt.s32.f32 %v518_v52 }
 0x2a2   :  { %v1708_v55 = vsel %vm227_vm1, %v475_v46, 2147483647  ;;  %v1715_v58 = vsel %vm227_vm1, %v480_v56, 2147483647 }
 0x2a3   :  { %656 = vmin.xlane.f32.xlu1 %v1702_v49  ;;  %v1711_v61 = vpop.xlane.xlu1 %446  ;;  %v563_v0 = vshra.s32 %v1708_v55, 16  ;;  %521 = vmin.xlane.f32.xlu0 %v1705_v54  ;;  %v1720_v59 = vpop.xlane.xlu0 %419  ;;  %v638_v4 = vshra.s32 %v1715_v58, 16 }
 0x2a4   :  { %2596 = vst [vmem:[#allocation6_spill] sm:$0xff] %v1711_v61  ;;  %vm467_vm11 = vcmp.eq.f32.partialorder %v1579_v51, %v1711_v61  ;;  %2597 = vst [vmem:[#allocation7_spill] sm:$0xff] %v1720_v59  ;;  %vm458_vm12 = vcmp.eq.f32.partialorder %v1582_v53, %v1720_v59 }
 0x2a5   :  { %v483_v6 = vsel %vm467_vm11, %v1613_v7, 8  ;;  %v1726_v63 = vcvt.s32.f32 %v563_v0  ;;  %v474_v8 = vsel %vm458_vm12, %v1613_v7, 8  ;;  %v1729_v11 = vcvt.s32.f32 %v638_v4 }
 0x2a6   :  { %v1732_v13 = vsel %vm227_vm1, %v483_v6, 2147483647  ;;  %v1739_v24 = vsel %vm227_vm1, %v474_v8, 2147483647 }
 0x2a7   :  { %566 = vmin.xlane.f32.xlu1 %v1726_v63  ;;  %v1735_v14 = vpop.xlane.xlu1 %428  ;;  %v683_v23 = vshra.s32 %v1732_v13, 16  ;;  %641 = vmin.xlane.f32.xlu0 %v1729_v11  ;;  %v1744_v26 = vpop.xlane.xlu0 %443  ;;  %v548_v28 = vshra.s32 %v1739_v24, 16 }
 0x2a8   :  { %2598 = vst [vmem:[#allocation8_spill] sm:$0xff] %v1735_v14  ;;  %vm461_vm13 = vcmp.eq.f32.partialorder %v1589_v57, %v1735_v14  ;;  %2599 = vst [vmem:[#allocation9_spill] sm:$0xff] %v1744_v26  ;;  %vm466_vm14 = vcmp.eq.f32.partialorder %v1592_v60, %v1744_v26 }
 0x2a9   :  { %v477_v33 = vsel %vm461_vm13, %v1613_v7, 8  ;;  %v1750_v36 = vcvt.s32.f32 %v683_v23  ;;  %v482_v39 = vsel %vm466_vm14, %v1613_v7, 8  ;;  %v1753_v41 = vcvt.s32.f32 %v548_v28 }
 0x2aa   :  { %v1756_v47 = vsel %vm227_vm1, %v477_v33, 2147483647  ;;  %v1763_v56 = vsel %vm227_vm1, %v482_v39, 2147483647 }
 0x2ab   :  { %686 = vmin.xlane.f32.xlu1 %v1750_v36  ;;  %v1759_v52 = vpop.xlane.xlu1 %452  ;;  %v593_v46 = vshra.s32 %v1756_v47, 16  ;;  %551 = vmin.xlane.f32.xlu0 %v1753_v41  ;;  %v1768_v0 = vpop.xlane.xlu0 %425  ;;  %v668_v4 = vshra.s32 %v1763_v56, 16 }
 0x2ac   :  { %2600 = vst [vmem:[#allocation10_spill] sm:$0xff] %v1759_v52  ;;  %vm469_vm15 = vcmp.eq.f32.partialorder %v1599_v1, %v1759_v52  ;;  %2601 = vst [vmem:[#allocation11_spill] sm:$0xff] %v1768_v0  ;;  %vm460_vm0 = vcmp.eq.f32.partialorder %v1602_v3, %v1768_v0 }
 0x2ad   :  { %v485_v6 = vsel %vm469_vm15, %v1613_v7, 8  ;;  %v1774_v8 = vcvt.s32.f32 %v593_v46  ;;  %v476_v23 = vsel %vm460_vm0, %v1613_v7, 8  ;;  %v1777_v28 = vcvt.s32.f32 %v668_v4 }
 0x2ae   :  { %v1780_v33 = vsel %vm227_vm1, %v485_v6, 2147483647  ;;  %v1785_v52 = vsel %vm227_vm1, %v476_v23, 2147483647 }
 0x2af   :  { %596 = vmin.xlane.f32.xlu1 %v1774_v8  ;;  %v713_v39 = vshra.s32 %v1780_v33, 16  ;;  %671 = vmin.xlane.f32.xlu0 %v1777_v28  ;;  %v1788_v26 = vpop.xlane.xlu0 %449  ;;  %v578_v46 = vshra.s32 %v1785_v52, 16 }
 0x2b0   :  { %2602 = vst [vmem:[#allocation12_spill] sm:$0xff] %v1788_v26  ;;  %vm468_vm2 = vcmp.eq.f32.partialorder %v1609_v5, %v1788_v26  ;;  %v487_v26 = vand.u32 65535, %v1637_v17  ;;  %v532_v17 = vand.u32 65535, %v1664_v31 }
 0x2b1   :  { %v1793_v4 = vcvt.s32.f32 %v713_v39  ;;  %v484_v6 = vsel %vm468_vm2, %v1613_v7, 8  ;;  %v1796_v0 = vcvt.s32.f32 %v578_v46  ;;  %v502_v39 = vand.u32 65535, %v1623_v10 }
 0x2b2   :  { %v1800_v23 = vsel %vm227_vm1, %v484_v6, 2147483647  ;;  %v624_v10 = vcvt.s32.f32 %v622_v50  ;;  %v534_v30 = vcvt.s32.f32 %v532_v17 }
 0x2b3   :  { %716 = vmin.xlane.f32.xlu1 %v1793_v4  ;;  %581 = vmin.xlane.f32.xlu0 %v1796_v0  ;;  %v698_v14 = vshra.s32 %v1800_v23, 16  ;;  %v504_v46 = vcvt.s32.f32 %v502_v39 }
 0x2b5   :  { %v1804_v59 = vcvt.s32.f32 %v698_v14  ;;  %v489_v14 = vcvt.s32.f32 %v487_v26  ;;  %v609_v26 = vcvt.s32.f32 %v607_v32 }
 0x2b7   :  { %701 = vmin.xlane.f32.xlu0 %v1804_v59 }
 0x31f   :  { %v1809_v61 = vpop.xlane.xlu1 %506 }
 0x320   :  { %vm508_vm3 = vcmp.eq.f32.partialorder %v1634_v15, %v1809_v61 }
 0x321   :  { %v509_v6 = vsel %vm508_vm3, %v504_v46, inf }
 0x322   :  { %510 = vmin.xlane.f32.xlu1 %v509_v6 }
 0x323   :  { %v1814_v45 = vpop.xlane.xlu0 %491 }
 0x324   :  { %v1817_v34 = vpop.xlane.xlu1 %626  ;;  %vm493_vm4 = vcmp.eq.f32.partialorder %v1654_v27, %v1814_v45  ;;  %v652_v27 = vand.u32 65535, %v1685_v42  ;;  %v637_v42 = vand.u32 65535, %v1715_v58  ;;  %v547_v58 = vand.u32 65535, %v1739_v24 }
 0x325   :  { %vm628_vm5 = vcmp.eq.f32.partialorder %v1657_v29, %v1817_v34  ;;  %v494_v21 = vsel %vm493_vm4, %v489_v14, inf  ;;  %v517_v29 = vand.u32 65535, %v1692_v48  ;;  %v562_v14 = vand.u32 65535, %v1708_v55 }
 0x326   :  { %v629_v15 = vsel %vm628_vm5, %v624_v10, inf  ;;  %495 = vmin.xlane.f32.xlu0 %v494_v21  ;;  %v654_v32 = vcvt.s32.f32 %v652_v27  ;;  %v682_v55 = vand.u32 65535, %v1732_v13  ;;  %v592_v13 = vand.u32 65535, %v1756_v47 }
 0x327   :  { %630 = vmin.xlane.f32.xlu1 %v629_v15  ;;  %v1824_v39 = vpop.xlane.xlu0 %611  ;;  %v564_v21 = vcvt.s32.f32 %v562_v14  ;;  %v667_v24 = vand.u32 65535, %v1763_v56  ;;  %v712_v47 = vand.u32 65535, %v1780_v33  ;;  %v577_v56 = vand.u32 65535, %v1785_v52 }
 0x328   :  { %v1826_v46 = vpop.xlane.xlu1 %536  ;;  %vm613_vm6 = vcmp.eq.f32.partialorder %v1675_v38, %v1824_v39  ;;  %v519_v38 = vcvt.s32.f32 %v517_v29  ;;  %v684_v27 = vcvt.s32.f32 %v682_v55 }
 0x329   :  { %vm538_vm7 = vcmp.eq.f32.partialorder %v1680_v40, %v1826_v46  ;;  %v614_v31 = vsel %vm613_vm6, %v609_v26, inf  ;;  %v579_v33 = vcvt.s32.f32 %v577_v56 }
 0x32a   :  { %v539_v50 = vsel %vm538_vm7, %v534_v30, inf  ;;  %615 = vmin.xlane.f32.xlu0 %v614_v31 }
 0x32b   :  { %540 = vmin.xlane.f32.xlu1 %v539_v50 }
 0x32c   :  { %v1834_v6 = vpop.xlane.xlu1 %656  ;;  %v1837_v10 = vpop.xlane.xlu0 %521 }
 0x32d   :  { %vm658_vm8 = vcmp.eq.f32.partialorder %v1702_v49, %v1834_v6  ;;  %vm523_vm9 = vcmp.eq.f32.partialorder %v1705_v54, %v1837_v10  ;;  %v639_v49 = vcvt.s32.f32 %v637_v42 }
 0x32e   :  { %v659_v40 = vsel %vm658_vm8, %v654_v32, inf  ;;  %v524_v48 = vsel %vm523_vm9, %v519_v38, inf  ;;  %v594_v32 = vcvt.s32.f32 %v592_v13 }
 0x32f   :  { %660 = vmin.xlane.f32.xlu1 %v659_v40  ;;  %525 = vmin.xlane.f32.xlu0 %v524_v48  ;;  %v714_v40 = vcvt.s32.f32 %v712_v47 }
 0x330   :  { %v1844_v17 = vpop.xlane.xlu1 %566  ;;  %v1847_v15 = vpop.xlane.xlu0 %641 }
 0x331   :  { %vm568_vm10 = vcmp.eq.f32.partialorder %v1726_v63, %v1844_v17  ;;  %vm643_vm11 = vcmp.eq.f32.partialorder %v1729_v11, %v1847_v15  ;;  %v549_v63 = vcvt.s32.f32 %v547_v58  ;;  %v498_v58 = vcvt.f32.s32 %v1814_v45 }
 0x332   :  { %v569_v26 = vsel %vm568_vm10, %v564_v21, inf  ;;  %v644_v54 = vsel %vm643_vm11, %v639_v49, inf }
 0x333   :  { %570 = vmin.xlane.f32.xlu1 %v569_v26  ;;  %645 = vmin.xlane.f32.xlu0 %v644_v54  ;;  %v633_v54 = vcvt.f32.s32 %v1817_v34 }
 0x334   :  { %v1854_v30 = vpop.xlane.xlu1 %686  ;;  %v1857_v31 = vpop.xlane.xlu0 %551 }
 0x335   :  { %vm688_vm12 = vcmp.eq.f32.partialorder %v1750_v36, %v1854_v30  ;;  %vm553_vm13 = vcmp.eq.f32.partialorder %v1753_v41, %v1857_v31  ;;  %v669_v36 = vcvt.s32.f32 %v667_v24  ;;  %v499_v24 = vshll.u32 %v498_v58, 16 }
 0x336   :  { %v689_v29 = vsel %vm688_vm12, %v684_v27, inf  ;;  %v554_v11 = vsel %vm553_vm13, %v549_v63, inf  ;;  %v618_v27 = vcvt.f32.s32 %v1824_v39 }
 0x337   :  { %690 = vmin.xlane.f32.xlu1 %v689_v29  ;;  %555 = vmin.xlane.f32.xlu0 %v554_v11  ;;  %v543_v29 = vcvt.f32.s32 %v1826_v46 }
 0x338   :  { %v1864_v50 = vpop.xlane.xlu1 %596  ;;  %v1867_v14 = vpop.xlane.xlu0 %671 }
 0x339   :  { %vm598_vm14 = vcmp.eq.f32.partialorder %v1774_v8, %v1864_v50  ;;  %vm673_vm15 = vcmp.eq.f32.partialorder %v1777_v28, %v1867_v14  ;;  %v697_v8 = vand.u32 65535, %v1800_v23  ;;  %v544_v46 = vshll.u32 %v543_v29, 16 }
 0x33a   :  { %v599_v38 = vsel %vm598_vm14, %v594_v32, inf  ;;  %v674_v41 = vsel %vm673_vm15, %v669_v36, inf  ;;  %v634_v32 = vshll.u32 %v633_v54, 16  ;;  %v648_v54 = vcvt.f32.s32 %v1847_v15 }
 0x33b   :  { %600 = vmin.xlane.f32.xlu1 %v599_v38  ;;  %675 = vmin.xlane.f32.xlu0 %v674_v41  ;;  %v699_v55 = vcvt.s32.f32 %v697_v8  ;;  %v663_v38 = vcvt.f32.s32 %v1834_v6  ;;  %v693_v15 = vcvt.f32.s32 %v1854_v30 }
 0x33c   :  { %v1874_v42 = vpop.xlane.xlu1 %716  ;;  %v1876_v48 = vpop.xlane.xlu0 %581 }
 0x33d   :  { %vm718_vm0 = vcmp.eq.f32.partialorder %v1793_v4, %v1874_v42  ;;  %vm583_vm2 = vcmp.eq.f32.partialorder %v1796_v0, %v1876_v48  ;;  %v513_v4 = vcvt.f32.s32 %v1809_v61  ;;  %v619_v61 = vshll.u32 %v618_v27, 16 }
 0x33e   :  { %v719_v21 = vsel %vm718_vm0, %v714_v40, inf  ;;  %v584_v52 = vsel %vm583_vm2, %v579_v33, inf  ;;  %v528_v33 = vcvt.f32.s32 %v1837_v10 }
 0x33f   :  { %720 = vmin.xlane.f32.xlu1 %v719_v21  ;;  %585 = vmin.xlane.f32.xlu0 %v584_v52  ;;  %v514_v26 = vshll.u32 %v513_v4, 16  ;;  %v573_v4 = vcvt.f32.s32 %v1844_v17 }
 0x340   :  { %v1883_v28 = vpop.xlane.xlu0 %701  ;;  %v529_v58 = vshll.u32 %v528_v33, 16 }
 0x341   :  { %vm703_vm3 = vcmp.eq.f32.partialorder %v1804_v59, %v1883_v28  ;;  %v574_v29 = vshll.u32 %v573_v4, 16 }
 0x342   :  { %v704_v49 = vsel %vm703_vm3, %v699_v55, inf }
 0x343   :  { %705 = vmin.xlane.f32.xlu0 %v704_v49  ;;  %v664_v49 = vshll.u32 %v663_v38, 16 }
 0x3ab   :  { %v511_v23 = vpop.xlane.xlu1 %510 }
 0x3ac   :  { %v512_v0 = vcvt.f32.s32 %v511_v23 }
 0x3ae   :  { %v1891_v13 = vadd.s32 %v514_v26, %v512_v0 }
 0x3af   :  { %v496_v63 = vpop.xlane.xlu0 %495 }
 0x3b0   :  { %v631_v59 = vpop.xlane.xlu1 %630  ;;  %v497_v11 = vcvt.f32.s32 %v496_v63  ;;  %vm760_vm4 = vcmp.eq.s32.totalorder %v1613_v7, %v1891_v13 }
 0x3b1   :  { %v632_v47 = vcvt.f32.s32 %v631_v59  ;;  %v1899_v34 = vsel %vm760_vm4, -1.0, %v1534_v12 }
 0x3b2   :  { %v1896_v45 = vadd.s32 %v499_v24, %v497_v11  ;;  %v794_v36 = vsel %vm227_vm1, %v1899_v34, -inf  ;;  %v558_v11 = vcvt.f32.s32 %v1857_v31 }
 0x3b3   :  { %v1901_v39 = vadd.s32 %v634_v32, %v632_v47  ;;  %v616_v56 = vpop.xlane.xlu0 %615  ;;  %795 = vmax.xlane.f32.xlu1 %v794_v36  ;;  %v649_v47 = vshll.u32 %v648_v54, 16  ;;  %v588_v54 = vcvt.f32.s32 %v1876_v48 }
 0x3b4   :  { %v541_v41 = vpop.xlane.xlu1 %540  ;;  %v617_v40 = vcvt.f32.s32 %v616_v56  ;;  %vm759_vm5 = vcmp.eq.s32.totalorder %v1613_v7, %v1896_v45  ;;  %v559_v33 = vshll.u32 %v558_v11, 16 }
 0x3b5   :  { %v542_v12 = vcvt.f32.s32 %v541_v41  ;;  %vm768_vm6 = vcmp.eq.s32.totalorder %v1613_v7, %v1901_v39  ;;  %v1912_v8 = vsel %vm759_vm5, -1.0, %v1539_v19  ;;  %vm726_vm5 = vcmp.eq.s32.totalorder %v1613_v7, 0 }
 0x3b6   :  { %v1914_v21 = vadd.s32 %v619_v61, %v617_v40  ;;  %v1917_v52 = vsel %vm768_vm6, -1.0, %v1542_v20  ;;  %v791_v6 = vsel %vm227_vm1, %v1912_v8, -inf  ;;  %v694_v40 = vshll.u32 %v693_v15, 16 }
 0x3b7   :  { %v1921_v55 = vadd.s32 %v544_v46, %v542_v12  ;;  %v818_v10 = vsel %vm227_vm1, %v1917_v52, -inf  ;;  %792 = vmax.xlane.f32.xlu0 %v791_v6  ;;  %v603_v46 = vcvt.f32.s32 %v1864_v50  ;;  %vm1111_vm6 = vcmp.eq.s32.totalorder %v1613_v7, 1 }
 0x3b8   :  { %819 = vmax.xlane.f32.xlu1 %v818_v10  ;;  %v661_v19 = vpop.xlane.xlu1 %660  ;;  %vm767_vm7 = vcmp.eq.s32.totalorder %v1613_v7, %v1914_v21  ;;  %v526_v23 = vpop.xlane.xlu0 %525 }
 0x3b9   :  { %v662_v20 = vcvt.f32.s32 %v661_v19  ;;  %vm762_vm8 = vcmp.eq.s32.totalorder %v1613_v7, %v1921_v55  ;;  %v1931_v26 = vsel %vm767_vm7, -1.0, %v1549_v25  ;;  %v527_v0 = vcvt.f32.s32 %v526_v23 }
 0x3ba   :  { %v1935_v27 = vsel %vm762_vm8, -1.0, %v1552_v22  ;;  %v815_v17 = vsel %vm227_vm1, %v1931_v26, -inf  ;;  %v723_v23 = vcvt.f32.s32 %v1874_v42  ;;  %vm1144_vm7 = vcmask 15360  }
 0x3bb   :  { %v1939_v63 = vadd.s32 %v664_v49, %v662_v20  ;;  %v800_v24 = vsel %vm227_vm1, %v1935_v27, -inf  ;;  %816 = vmax.xlane.f32.xlu0 %v815_v17  ;;  %v1943_v59 = vadd.s32 %v529_v58, %v527_v0  ;;  %v604_v58 = vshll.u32 %v603_v46, 16 }
 0x3bc   :  { %801 = vmax.xlane.f32.xlu1 %v800_v24  ;;  %v571_v25 = vpop.xlane.xlu1 %570  ;;  %v646_v32 = vpop.xlane.xlu0 %645 }
 0x3bd   :  { %v572_v22 = vcvt.f32.s32 %v571_v25  ;;  %vm770_vm9 = vcmp.eq.s32.totalorder %v1613_v7, %v1939_v63  ;;  %v647_v61 = vcvt.f32.s32 %v646_v32  ;;  %vm761_vm10 = vcmp.eq.s32.totalorder %v1613_v7, %v1943_v59 }
 0x3be   :  { %v1950_v36 = vsel %vm770_vm9, -1.0, %v1559_v35  ;;  %v1959_v31 = vsel %vm761_vm10, -1.0, %v1562_v37  ;;  %v678_v37 = vcvt.f32.s32 %v1867_v14  ;;  %v589_v32 = vshll.u32 %v588_v54, 16 }
 0x3bf   :  { %v1954_v56 = vadd.s32 %v574_v29, %v572_v22  ;;  %v824_v30 = vsel %vm227_vm1, %v1950_v36, -inf  ;;  %v1962_v38 = vadd.s32 %v649_v47, %v647_v61  ;;  %v797_v35 = vsel %vm227_vm1, %v1959_v31, -inf }
 0x3c0   :  { %825 = vmax.xlane.f32.xlu1 %v824_v30  ;;  %v691_v41 = vpop.xlane.xlu1 %690  ;;  %798 = vmax.xlane.f32.xlu0 %v797_v35  ;;  %v556_v6 = vpop.xlane.xlu0 %555  ;;  %v708_v30 = vcvt.f32.s32 %v1883_v28  ;;  %v727_v54 = vsel %vm726_vm5, %v1620_v9, 0.0 }
 0x3c1   :  { %v692_v12 = vcvt.f32.s32 %v691_v41  ;;  %vm764_vm11 = vcmp.eq.s32.totalorder %v1613_v7, %v1954_v56  ;;  %v557_v10 = vcvt.f32.s32 %v556_v6  ;;  %vm769_vm12 = vcmp.eq.s32.totalorder %v1613_v7, %v1962_v38 }
 0x3c2   :  { %v1970_v50 = vsel %vm764_vm11, -1.0, %v1569_v43  ;;  %v1979_v19 = vsel %vm769_vm12, -1.0, %v1572_v44  ;;  %v679_v44 = vshll.u32 %v678_v37, 16 }
 0x3c3   :  { %v1974_v49 = vadd.s32 %v694_v40, %v692_v12  ;;  %v806_v4 = vsel %vm227_vm1, %v1970_v50, -inf  ;;  %v1981_v20 = vadd.s32 %v559_v33, %v557_v10  ;;  %v821_v43 = vsel %vm227_vm1, %v1979_v19, -inf }
 0x3c4   :  { %807 = vmax.xlane.f32.xlu1 %v806_v4  ;;  %v601_v14 = vpop.xlane.xlu1 %600  ;;  %822 = vmax.xlane.f32.xlu0 %v821_v43  ;;  %v676_v17 = vpop.xlane.xlu0 %675  ;;  %v709_v12 = vshll.u32 %v708_v30, 16 }
 0x3c5   :  { %v602_v0 = vcvt.f32.s32 %v601_v14  ;;  %vm772_vm13 = vcmp.eq.s32.totalorder %v1613_v7, %v1974_v49  ;;  %v677_v24 = vcvt.f32.s32 %v676_v17  ;;  %vm763_vm14 = vcmp.eq.s32.totalorder %v1613_v7, %v1981_v20 }
 0x3c6   :  { %v1990_v29 = vsel %vm772_vm13, -1.0, %v1579_v51  ;;  %v1999_v48 = vsel %vm763_vm14, -1.0, %v1582_v53  ;;  %v724_v51 = vshll.u32 %v723_v23, 16 }
 0x3c7   :  { %v1994_v25 = vadd.s32 %v604_v58, %v602_v0  ;;  %v830_v42 = vsel %vm227_vm1, %v1990_v29, -inf  ;;  %v2001_v15 = vadd.s32 %v679_v44, %v677_v24  ;;  %v803_v22 = vsel %vm227_vm1, %v1999_v48, -inf }
 0x3c8   :  { %831 = vmax.xlane.f32.xlu1 %v830_v42  ;;  %v721_v11 = vpop.xlane.xlu1 %720  ;;  %804 = vmax.xlane.f32.xlu0 %v803_v22  ;;  %v586_v61 = vpop.xlane.xlu0 %585 }
 0x3c9   :  { %v722_v47 = vcvt.f32.s32 %v721_v11  ;;  %vm766_vm15 = vcmp.eq.s32.totalorder %v1613_v7, %v1994_v25  ;;  %v587_v46 = vcvt.f32.s32 %v586_v61  ;;  %vm771_vm0 = vcmp.eq.s32.totalorder %v1613_v7, %v2001_v15 }
 0x3ca   :  { %v2009_v53 = vsel %vm766_vm15, -1.0, %v1589_v57  ;;  %v2018_v40 = vsel %vm771_vm0, -1.0, %v1592_v60  ;;  %v735_v11 = vsel %vm726_vm5, %v1639_v18, 0.0 }
 0x3cb   :  { %v2013_v41 = vadd.s32 %v724_v51, %v722_v47  ;;  %v812_v35 = vsel %vm227_vm1, %v2009_v53, -inf  ;;  %v2020_v33 = vadd.s32 %v589_v32, %v587_v46  ;;  %v827_v28 = vsel %vm227_vm1, %v2018_v40, -inf }
 0x3cc   :  { %813 = vmax.xlane.f32.xlu1 %v812_v35  ;;  %828 = vmax.xlane.f32.xlu0 %v827_v28  ;;  %v706_v57 = vpop.xlane.xlu0 %705  ;;  %v730_v47 = vsel %vm726_vm5, %v1646_v16, 0.0 }
 0x3cd   :  { %vm774_vm2 = vcmp.eq.s32.totalorder %v1613_v7, %v2013_v41  ;;  %v707_v6 = vcvt.f32.s32 %v706_v57  ;;  %vm765_vm3 = vcmp.eq.s32.totalorder %v1613_v7, %v2020_v33 }
 0x3ce   :  { %v2027_v37 = vsel %vm774_vm2, -1.0, %v1599_v1  ;;  %v2034_v10 = vsel %vm765_vm3, -1.0, %v1602_v3  ;;  %v728_v3 = vsel %vm726_vm5, %v1615_v62, 0.0 }
 0x3cf   :  { %v836_v60 = vsel %vm227_vm1, %v2027_v37, -inf  ;;  %v2036_v4 = vadd.s32 %v709_v12, %v707_v6  ;;  %v809_v58 = vsel %vm227_vm1, %v2034_v10, -inf  ;;  %v2603_v6 = vld [vmem:[#allocation2_spill] sm:$0xff] }
 0x3d0   :  { %837 = vmax.xlane.f32.xlu1 %v836_v60  ;;  %810 = vmax.xlane.f32.xlu0 %v809_v58  ;;  %v738_v60 = vsel %vm726_vm5, %v2603_v6, 0.0 }
 0x3d1   :  { %vm773_vm4 = vcmp.eq.s32.totalorder %v1613_v7, %v2036_v4 }
 0x3d2   :  { %v2043_v1 = vsel %vm773_vm4, -1.0, %v1609_v5 }
 0x3d3   :  { %v833_v14 = vsel %vm227_vm1, %v2043_v1, -inf }
 0x3d4   :  { %834 = vmax.xlane.f32.xlu0 %v833_v14 }
 0x43c   :  { %v796_v43 = vpop.xlane.xlu1 %795 }
 0x43d   :  { %vm840_vm8 = vcmp.eq.f32.partialorder %v1899_v34, %v796_v43  ;;  %v1113_v5 = vsel %vm1111_vm6, %v796_v43, %v728_v3  ;;  %v736_v34 = vsel %vm726_vm5, %v1625_v2, 0.0  ;;  %v2604_v3 = vld [vmem:[#allocation3_spill] sm:$0xff] }
 0x43e   :  { %v856_v23 = vsel %vm840_vm8, %v1613_v7, 8  ;;  %1146 = vst.msk [vmem:[%s2579_s2 + $0x8] sm:$0xff] %vm1144_vm7, %v1113_v5  ;;  %v729_v43 = vsel %vm726_vm5, %v2604_v3, 0.0 }
 0x43f   :  { %v2064_v62 = vsel %vm227_vm1, %v856_v23, 2147483647 }
 0x440   :  { %v793_v0 = vpop.xlane.xlu0 %792  ;;  %v888_v24 = vshra.s32 %v2064_v62, 16 }
 0x441   :  { %v820_v17 = vpop.xlane.xlu1 %819  ;;  %vm839_vm9 = vcmp.eq.f32.partialorder %v1912_v8, %v793_v0  ;;  %v1112_v44 = vsel %vm1111_vm6, %v793_v0, %v727_v54 }
 0x442   :  { %vm848_vm10 = vcmp.eq.f32.partialorder %v1917_v52, %v820_v17  ;;  %v1121_v9 = vsel %vm1111_vm6, %v820_v17, %v736_v34  ;;  %v855_v42 = vsel %vm839_vm9, %v1613_v7, 8  ;;  %1145 = vst.msk [vmem:[%s2579_s2] sm:$0xff] %vm1144_vm7, %v1112_v44  ;;  %v2086_v8 = vcvt.s32.f32 %v888_v24  ;;  %v2605_v24 = vld [vmem:[#allocation4_spill] sm:$0xff] }
 0x443   :  { %v864_v2 = vsel %vm848_vm10, %v1613_v7, 8  ;;  %1154 = vst.msk [vmem:[%s2579_s2 + $0x48] sm:$0xff] %vm1144_vm7, %v1121_v9  ;;  %v2089_v52 = vsel %vm227_vm1, %v855_v42, 2147483647 }
 0x444   :  { %v2095_v22 = vsel %vm227_vm1, %v864_v2, 2147483647  ;;  %v817_v51 = vpop.xlane.xlu0 %816  ;;  %v873_v32 = vshra.s32 %v2089_v52, 16  ;;  %891 = vmin.xlane.f32.xlu1 %v2086_v8 }
 0x445   :  { %v802_v61 = vpop.xlane.xlu1 %801  ;;  %vm847_vm11 = vcmp.eq.f32.partialorder %v1931_v26, %v817_v51  ;;  %v1120_v30 = vsel %vm1111_vm6, %v817_v51, %v735_v11  ;;  %v1008_v18 = vshra.s32 %v2095_v22, 16  ;;  %v2606_v11 = vld [vmem:[#allocation5_spill] sm:$0xff] }
 0x446   :  { %vm842_vm12 = vcmp.eq.f32.partialorder %v1935_v27, %v802_v61  ;;  %v1115_v46 = vsel %vm1111_vm6, %v802_v61, %v730_v47  ;;  %v863_v35 = vsel %vm847_vm11, %v1613_v7, 8  ;;  %1153 = vst.msk [vmem:[%s2579_s2 + $0x40] sm:$0xff] %vm1144_vm7, %v1120_v30  ;;  %v2114_v16 = vcvt.s32.f32 %v873_v32 }
 0x447   :  { %v858_v26 = vsel %vm842_vm12, %v1613_v7, 8  ;;  %1148 = vst.msk [vmem:[%s2579_s2 + $0x18] sm:$0xff] %vm1144_vm7, %v1115_v46  ;;  %v2122_v27 = vsel %vm227_vm1, %v863_v35, 2147483647  ;;  %v2124_v28 = vcvt.s32.f32 %v1008_v18  ;;  %v737_v51 = vsel %vm726_vm5, %v2606_v11, 0.0 }
 0x448   :  { %v2127_v57 = vsel %vm227_vm1, %v858_v26, 2147483647  ;;  %876 = vmin.xlane.f32.xlu0 %v2114_v16  ;;  %v993_v12 = vshra.s32 %v2122_v27, 16 }
 0x449   :  { %1011 = vmin.xlane.f32.xlu1 %v2124_v28  ;;  %v826_v58 = vpop.xlane.xlu1 %825  ;;  %v918_v14 = vshra.s32 %v2127_v57, 16  ;;  %v799_v23 = vpop.xlane.xlu0 %798 }
 0x44a   :  { %vm850_vm13 = vcmp.eq.f32.partialorder %v1950_v36, %v826_v58  ;;  %v1123_v5 = vsel %vm1111_vm6, %v826_v58, %v738_v60  ;;  %v2142_v54 = vcvt.s32.f32 %v993_v12  ;;  %vm841_vm14 = vcmp.eq.f32.partialorder %v1959_v31, %v799_v23  ;;  %v2607_v12 = vld [vmem:[#allocation6_spill] sm:$0xff] }
 0x44b   :  { %v866_v0 = vsel %vm850_vm13, %v1613_v7, 8  ;;  %1156 = vst.msk [vmem:[%s2579_s2 + $0x58] sm:$0xff] %vm1144_vm7, %v1123_v5  ;;  %v1114_v34 = vsel %vm1111_vm6, %v799_v23, %v729_v43  ;;  %v2152_v17 = vcvt.s32.f32 %v918_v14  ;;  %v857_v44 = vsel %vm841_vm14, %v1613_v7, 8  ;;  %v2608_v14 = vld [vmem:[#allocation7_spill] sm:$0xff] }
 0x44c   :  { %v2155_v36 = vsel %vm227_vm1, %v866_v0, 2147483647  ;;  %1147 = vst.msk [vmem:[%s2579_s2 + $0x10] sm:$0xff] %vm1144_vm7, %v1114_v34  ;;  %996 = vmin.xlane.f32.xlu0 %v2142_v54  ;;  %v732_v31 = vsel %vm726_vm5, %v2605_v24, 0.0  ;;  %v2167_v9 = vsel %vm227_vm1, %v857_v44, 2147483647 }
 0x44d   :  { %921 = vmin.xlane.f32.xlu1 %v2152_v17  ;;  %v808_v42 = vpop.xlane.xlu1 %807  ;;  %v1038_v2 = vshra.s32 %v2155_v36, 16  ;;  %v823_v47 = vpop.xlane.xlu0 %822  ;;  %v903_v61 = vshra.s32 %v2167_v9, 16  ;;  %v731_v3 = vsel %vm726_vm5, %v2608_v14, 0.0  ;;  %v2611_v14 = vld [vmem:[#allocation10_spill] sm:$0xff] }
 0x44e   :  { %vm844_vm15 = vcmp.eq.f32.partialorder %v1970_v50, %v808_v42  ;;  %v1117_v32 = vsel %vm1111_vm6, %v808_v42, %v732_v31  ;;  %vm849_vm0 = vcmp.eq.f32.partialorder %v1979_v19, %v823_v47  ;;  %v1122_v18 = vsel %vm1111_vm6, %v823_v47, %v737_v51  ;;  %v2609_v42 = vld [vmem:[#allocation8_spill] sm:$0xff] }
 0x44f   :  { %v860_v30 = vsel %vm844_vm15, %v1613_v7, 8  ;;  %1150 = vst.msk [vmem:[%s2579_s2 + $0x28] sm:$0xff] %vm1144_vm7, %v1117_v32  ;;  %v2186_v46 = vcvt.s32.f32 %v1038_v2  ;;  %v865_v35 = vsel %vm849_vm0, %v1613_v7, 8  ;;  %1155 = vst.msk [vmem:[%s2579_s2 + $0x50] sm:$0xff] %vm1144_vm7, %v1122_v18  ;;  %v2196_v26 = vcvt.s32.f32 %v903_v61  ;;  %v2610_v32 = vld [vmem:[#allocation9_spill] sm:$0xff] }
 0x450   :  { %v2189_v50 = vsel %vm227_vm1, %v860_v30, 2147483647  ;;  %v740_v19 = vsel %vm726_vm5, %v2607_v12, 0.0  ;;  %v2202_v6 = vsel %vm227_vm1, %v865_v35, 2147483647  ;;  %v739_v47 = vsel %vm726_vm5, %v2610_v32, 0.0 }
 0x451   :  { %1041 = vmin.xlane.f32.xlu1 %v2186_v46  ;;  %v832_v60 = vpop.xlane.xlu1 %831  ;;  %v948_v58 = vshra.s32 %v2189_v50, 16  ;;  %906 = vmin.xlane.f32.xlu0 %v2196_v26  ;;  %v805_v5 = vpop.xlane.xlu0 %804  ;;  %v1023_v23 = vshra.s32 %v2202_v6, 16 }
 0x452   :  { %vm852_vm2 = vcmp.eq.f32.partialorder %v1990_v29, %v832_v60  ;;  %v1125_v43 = vsel %vm1111_vm6, %v832_v60, %v740_v19  ;;  %vm843_vm3 = vcmp.eq.f32.partialorder %v1999_v48, %v805_v5  ;;  %v1116_v29 = vsel %vm1111_vm6, %v805_v5, %v731_v3 }
 0x453   :  { %v868_v0 = vsel %vm852_vm2, %v1613_v7, 8  ;;  %1158 = vst.msk [vmem:[%s2579_s2 + $0x68] sm:$0xff] %vm1144_vm7, %v1125_v43  ;;  %v2222_v34 = vcvt.s32.f32 %v948_v58  ;;  %v859_v24 = vsel %vm843_vm3, %v1613_v7, 8  ;;  %1149 = vst.msk [vmem:[%s2579_s2 + $0x20] sm:$0xff] %vm1144_vm7, %v1116_v29  ;;  %v2232_v31 = vcvt.s32.f32 %v1023_v23  ;;  %v2612_v23 = vld [vmem:[#allocation11_spill] sm:$0xff] }
 0x454   :  { %v2225_v44 = vsel %vm227_vm1, %v868_v0, 2147483647  ;;  %v734_v48 = vsel %vm726_vm5, %v2609_v42, 0.0  ;;  %v2238_v2 = vsel %vm227_vm1, %v859_v24, 2147483647  ;;  %v733_v0 = vsel %vm726_vm5, %v2612_v23, 0.0 }
 0x455   :  { %951 = vmin.xlane.f32.xlu1 %v2222_v34  ;;  %v814_v11 = vpop.xlane.xlu1 %813  ;;  %v1068_v51 = vshra.s32 %v2225_v44, 16  ;;  %1026 = vmin.xlane.f32.xlu0 %v2232_v31  ;;  %v829_v30 = vpop.xlane.xlu0 %828  ;;  %v933_v18 = vshra.s32 %v2238_v2, 16 }
 0x456   :  { %vm846_vm4 = vcmp.eq.f32.partialorder %v2009_v53, %v814_v11  ;;  %v1119_v61 = vsel %vm1111_vm6, %v814_v11, %v734_v48  ;;  %vm851_vm8 = vcmp.eq.f32.partialorder %v2018_v40, %v829_v30  ;;  %v1124_v53 = vsel %vm1111_vm6, %v829_v30, %v739_v47  ;;  %v2613_v30 = vld [vmem:[#allocation12_spill] sm:$0xff] }
 0x457   :  { %v862_v35 = vsel %vm846_vm4, %v1613_v7, 8  ;;  %1152 = vst.msk [vmem:[%s2579_s2 + $0x38] sm:$0xff] %vm1144_vm7, %v1119_v61  ;;  %v2258_v12 = vcvt.s32.f32 %v1068_v51  ;;  %v867_v60 = vsel %vm851_vm8, %v1613_v7, 8  ;;  %1157 = vst.msk [vmem:[%s2579_s2 + $0x60] sm:$0xff] %vm1144_vm7, %v1124_v53  ;;  %v2268_v58 = vcvt.s32.f32 %v933_v18 }
 0x458   :  { %v2261_v19 = vsel %vm227_vm1, %v862_v35, 2147483647  ;;  %v742_v40 = vsel %vm726_vm5, %v2611_v14, 0.0  ;;  %v2274_v3 = vsel %vm227_vm1, %v867_v60, 2147483647  ;;  %v741_v18 = vsel %vm726_vm5, %v2613_v30, 0.0 }
 0x459   :  { %1071 = vmin.xlane.f32.xlu1 %v2258_v12  ;;  %v838_v43 = vpop.xlane.xlu1 %837  ;;  %v978_v5 = vshra.s32 %v2261_v19, 16  ;;  %936 = vmin.xlane.f32.xlu0 %v2268_v58  ;;  %v811_v24 = vpop.xlane.xlu0 %810  ;;  %v1053_v42 = vshra.s32 %v2274_v3, 16  ;;  %v992_v30 = vand.u32 65535, %v2122_v27 }
 0x45a   :  { %vm854_vm9 = vcmp.eq.f32.partialorder %v2027_v37, %v838_v43  ;;  %v1127_v29 = vsel %vm1111_vm6, %v838_v43, %v742_v40  ;;  %vm845_vm10 = vcmp.eq.f32.partialorder %v2034_v10, %v811_v24  ;;  %v1118_v37 = vsel %vm1111_vm6, %v811_v24, %v733_v0 }
 0x45b   :  { %v870_v48 = vsel %vm854_vm9, %v1613_v7, 8  ;;  %1160 = vst.msk [vmem:[%s2579_s2 + $0x78] sm:$0xff] %vm1144_vm7, %v1127_v29  ;;  %v2294_v11 = vcvt.s32.f32 %v978_v5  ;;  %v861_v32 = vsel %vm845_vm10, %v1613_v7, 8  ;;  %1151 = vst.msk [vmem:[%s2579_s2 + $0x30] sm:$0xff] %vm1144_vm7, %v1118_v37  ;;  %v2304_v47 = vcvt.s32.f32 %v1053_v42 }
 0x45c   :  { %v2297_v51 = vsel %vm227_vm1, %v870_v48, 2147483647  ;;  %v2307_v61 = vsel %vm227_vm1, %v861_v32, 2147483647  ;;  %v887_v0 = vand.u32 65535, %v2064_v62  ;;  %v872_v29 = vand.u32 65535, %v2089_v52 }
 0x45d   :  { %981 = vmin.xlane.f32.xlu1 %v2294_v11  ;;  %v1098_v10 = vshra.s32 %v2297_v51, 16  ;;  %1056 = vmin.xlane.f32.xlu0 %v2304_v47  ;;  %v835_v35 = vpop.xlane.xlu0 %834  ;;  %v963_v53 = vshra.s32 %v2307_v61, 16  ;;  %v1007_v48 = vand.u32 65535, %v2095_v22  ;;  %v917_v52 = vand.u32 65535, %v2127_v57 }
 0x45e   :  { %vm853_vm11 = vcmp.eq.f32.partialorder %v2043_v1, %v835_v35  ;;  %v1126_v60 = vsel %vm1111_vm6, %v835_v35, %v741_v18  ;;  %v889_v42 = vcvt.s32.f32 %v887_v0 }
 0x45f   :  { %v2319_v14 = vcvt.s32.f32 %v1098_v10  ;;  %v869_v40 = vsel %vm853_vm11, %v1613_v7, 8  ;;  %1159 = vst.msk [vmem:[%s2579_s2 + $0x70] sm:$0xff] %vm1144_vm7, %v1126_v60  ;;  %v2326_v43 = vcvt.s32.f32 %v963_v53  ;;  %v874_v10 = vcvt.s32.f32 %v872_v29 }
 0x460   :  { %v2329_v5 = vsel %vm227_vm1, %v869_v40, 2147483647  ;;  %v1009_v62 = vcvt.s32.f32 %v1007_v48  ;;  %v994_v53 = vcvt.s32.f32 %v992_v30  ;;  %v919_v27 = vcvt.s32.f32 %v917_v52 }
 0x461   :  { %1101 = vmin.xlane.f32.xlu1 %v2319_v14  ;;  %966 = vmin.xlane.f32.xlu0 %v2326_v43  ;;  %v1083_v1 = vshra.s32 %v2329_v5, 16  ;;  %v947_v29 = vand.u32 65535, %v2189_v50  ;;  %v1067_v50 = vand.u32 65535, %v2225_v44  ;;  %v977_v44 = vand.u32 65535, %v2261_v19 }
 0x462   :  { %v1097_v19 = vand.u32 65535, %v2297_v51 }
 0x463   :  { %v2334_v23 = vcvt.s32.f32 %v1083_v1  ;;  %v1069_v52 = vcvt.s32.f32 %v1067_v50 }
 0x465   :  { %1086 = vmin.xlane.f32.xlu0 %v2334_v23 }
 0x4cd   :  { %v2339_v24 = vpop.xlane.xlu1 %891 }
 0x4ce   :  { %vm893_vm1 = vcmp.eq.f32.partialorder %v2086_v8, %v2339_v24 }
 0x4cf   :  { %v894_v37 = vsel %vm893_vm1, %v889_v42, inf  ;;  %v1022_v42 = vand.u32 65535, %v2202_v6  ;;  %v932_v6 = vand.u32 65535, %v2238_v2  ;;  %v1052_v2 = vand.u32 65535, %v2274_v3 }
 0x4d0   :  { %895 = vmin.xlane.f32.xlu1 %v894_v37  ;;  %v949_v37 = vcvt.s32.f32 %v947_v29  ;;  %v962_v3 = vand.u32 65535, %v2307_v61 }
 0x4d1   :  { %v2344_v32 = vpop.xlane.xlu0 %876 }
 0x4d2   :  { %v2347_v18 = vpop.xlane.xlu1 %1011  ;;  %vm878_vm12 = vcmp.eq.f32.partialorder %v2114_v16, %v2344_v32  ;;  %v1037_v16 = vand.u32 65535, %v2155_v36 }
 0x4d3   :  { %vm1013_vm13 = vcmp.eq.f32.partialorder %v2124_v28, %v2347_v18  ;;  %v879_v22 = vsel %vm878_vm12, %v874_v10, inf  ;;  %v902_v28 = vand.u32 65535, %v2167_v9  ;;  %v1024_v10 = vcvt.s32.f32 %v1022_v42 }
 0x4d4   :  { %v1014_v8 = vsel %vm1013_vm13, %v1009_v62, inf  ;;  %880 = vmin.xlane.f32.xlu0 %v879_v22  ;;  %v1039_v0 = vcvt.s32.f32 %v1037_v16  ;;  %v934_v22 = vcvt.s32.f32 %v932_v6  ;;  %v1054_v16 = vcvt.s32.f32 %v1052_v2 }
 0x4d5   :  { %1015 = vmin.xlane.f32.xlu1 %v1014_v8  ;;  %v2354_v35 = vpop.xlane.xlu0 %996  ;;  %v904_v36 = vcvt.s32.f32 %v902_v28  ;;  %v744_v6 = vsel %vm726_vm5, %v1891_v13, 0  ;;  %v743_v13 = vsel %vm726_vm5, %v1896_v45, 0 }
 0x4d6   :  { %v2356_v60 = vpop.xlane.xlu1 %921  ;;  %vm998_vm14 = vcmp.eq.f32.partialorder %v2142_v54, %v2354_v35 }
 0x4d7   :  { %vm923_vm15 = vcmp.eq.f32.partialorder %v2152_v17, %v2356_v60  ;;  %v999_v57 = vsel %vm998_vm14, %v994_v53, inf }
 0x4d8   :  { %v924_v40 = vsel %vm923_vm15, %v919_v27, inf  ;;  %1000 = vmin.xlane.f32.xlu0 %v999_v57  ;;  %v979_v27 = vcvt.s32.f32 %v977_v44 }
 0x4d9   :  { %925 = vmin.xlane.f32.xlu1 %v924_v40  ;;  %v1099_v40 = vcvt.s32.f32 %v1097_v19 }
 0x4da   :  { %v2364_v1 = vpop.xlane.xlu1 %1041  ;;  %v2369_v54 = vpop.xlane.xlu0 %906 }
 0x4db   :  { %vm1043_vm0 = vcmp.eq.f32.partialorder %v2186_v46, %v2364_v1  ;;  %vm908_vm2 = vcmp.eq.f32.partialorder %v2196_v26, %v2369_v54 }
 0x4dc   :  { %v1044_v17 = vsel %vm1043_vm0, %v1039_v0, inf  ;;  %v909_v9 = vsel %vm908_vm2, %v904_v36, inf  ;;  %v1082_v0 = vand.u32 65535, %v2329_v5 }
 0x4dd   :  { %1045 = vmin.xlane.f32.xlu1 %v1044_v17  ;;  %910 = vmin.xlane.f32.xlu0 %v909_v9  ;;  %v883_v17 = vcvt.f32.s32 %v2344_v32 }
 0x4de   :  { %v2374_v48 = vpop.xlane.xlu1 %951  ;;  %v2379_v46 = vpop.xlane.xlu0 %1026  ;;  %v1084_v36 = vcvt.s32.f32 %v1082_v0 }
 0x4df   :  { %vm953_vm3 = vcmp.eq.f32.partialorder %v2222_v34, %v2374_v48  ;;  %vm1028_vm4 = vcmp.eq.f32.partialorder %v2232_v31, %v2379_v46 }
 0x4e0   :  { %v954_v26 = vsel %vm953_vm3, %v949_v37, inf  ;;  %v1029_v30 = vsel %vm1028_vm4, %v1024_v10, inf }
 0x4e1   :  { %955 = vmin.xlane.f32.xlu1 %v954_v26  ;;  %1030 = vmin.xlane.f32.xlu0 %v1029_v30  ;;  %v884_v26 = vshll.u32 %v883_v17, 16 }
 0x4e2   :  { %v2384_v62 = vpop.xlane.xlu1 %1071  ;;  %v2389_v34 = vpop.xlane.xlu0 %936 }
 0x4e3   :  { %vm1073_vm8 = vcmp.eq.f32.partialorder %v2258_v12, %v2384_v62  ;;  %vm938_vm9 = vcmp.eq.f32.partialorder %v2268_v58, %v2389_v34 }
 0x4e4   :  { %v1074_v31 = vsel %vm1073_vm8, %v1069_v52, inf  ;;  %v939_v8 = vsel %vm938_vm9, %v934_v22, inf }
 0x4e5   :  { %1075 = vmin.xlane.f32.xlu1 %v1074_v31  ;;  %940 = vmin.xlane.f32.xlu0 %v939_v8 }
 0x4e6   :  { %v2394_v53 = vpop.xlane.xlu1 %981  ;;  %v2399_v12 = vpop.xlane.xlu0 %1056 }
 0x4e7   :  { %vm983_vm10 = vcmp.eq.f32.partialorder %v2294_v11, %v2394_v53  ;;  %vm1058_vm11 = vcmp.eq.f32.partialorder %v2304_v47, %v2399_v12  ;;  %v964_v11 = vcvt.s32.f32 %v962_v3  ;;  %v1048_v3 = vcvt.f32.s32 %v2364_v1 }
 0x4e8   :  { %v984_v58 = vsel %vm983_vm10, %v979_v27, inf  ;;  %v1059_v57 = vsel %vm1058_vm11, %v1054_v16, inf  ;;  %v751_v1 = vsel %vm726_vm5, %v1914_v21, 0 }
 0x4e9   :  { %985 = vmin.xlane.f32.xlu1 %v984_v58  ;;  %1060 = vmin.xlane.f32.xlu0 %v1059_v57 }
 0x4ea   :  { %v2404_v28 = vpop.xlane.xlu1 %1101  ;;  %v2408_v51 = vpop.xlane.xlu0 %966 }
 0x4eb   :  { %vm1103_vm1 = vcmp.eq.f32.partialorder %v2319_v14, %v2404_v28  ;;  %vm968_vm12 = vcmp.eq.f32.partialorder %v2326_v43, %v2408_v51  ;;  %v898_v14 = vcvt.f32.s32 %v2339_v24  ;;  %v1018_v43 = vcvt.f32.s32 %v2347_v18 }
 0x4ec   :  { %v1104_v61 = vsel %vm1103_vm1, %v1099_v40, inf  ;;  %v969_v47 = vsel %vm968_vm12, %v964_v11, inf  ;;  %v928_v24 = vcvt.f32.s32 %v2356_v60  ;;  %v752_v60 = vsel %vm726_vm5, %v1901_v39, 0 }
 0x4ed   :  { %1105 = vmin.xlane.f32.xlu1 %v1104_v61  ;;  %970 = vmin.xlane.f32.xlu0 %v969_v47  ;;  %v899_v9 = vshll.u32 %v898_v14, 16  ;;  %v1019_v44 = vshll.u32 %v1018_v43, 16  ;;  %v913_v39 = vcvt.f32.s32 %v2369_v54  ;;  %v746_v11 = vsel %vm726_vm5, %v1921_v55, 0 }
 0x4ee   :  { %v2413_v29 = vpop.xlane.xlu0 %1086  ;;  %v929_v16 = vshll.u32 %v928_v24, 16  ;;  %v1049_v54 = vshll.u32 %v1048_v3, 16  ;;  %v958_v47 = vcvt.f32.s32 %v2374_v48  ;;  %v1033_v55 = vcvt.f32.s32 %v2379_v46 }
 0x4ef   :  { %vm1088_vm13 = vcmp.eq.f32.partialorder %v2334_v23, %v2413_v29  ;;  %v1003_v23 = vcvt.f32.s32 %v2354_v35  ;;  %v914_v14 = vshll.u32 %v913_v39, 16  ;;  %v1078_v46 = vcvt.f32.s32 %v2384_v62 }
 0x4f0   :  { %v1089_v42 = vsel %vm1088_vm13, %v1084_v36, inf }
 0x4f1   :  { %1090 = vmin.xlane.f32.xlu0 %v1089_v42  ;;  %v1004_v31 = vshll.u32 %v1003_v23, 16  ;;  %v1034_v23 = vshll.u32 %v1033_v55, 16  ;;  %v749_v55 = vsel %vm726_vm5, %v2020_v33, 0  ;;  %v757_v33 = vsel %vm726_vm5, %v2036_v4, 0 }
 0x559   :  { %v896_v5 = vpop.xlane.xlu1 %895 }
 0x55a   :  { %v897_v37 = vcvt.f32.s32 %v896_v5  ;;  %v754_v5 = vsel %vm726_vm5, %v1939_v63, 0 }
 0x55c   :  { %v900_v50 = vadd.s32 %v899_v9, %v897_v37  ;;  %v745_v9 = vsel %vm726_vm5, %v1943_v59, 0 }
 0x55d   :  { %v881_v10 = vpop.xlane.xlu0 %880 }
 0x55e   :  { %v1016_v30 = vpop.xlane.xlu1 %1015  ;;  %v882_v52 = vcvt.f32.s32 %v881_v10  ;;  %v1129_v32 = vsel %vm1111_vm6, %v900_v50, %v744_v6  ;;  %v959_v50 = vshll.u32 %v958_v47, 16 }
 0x55f   :  { %v1017_v22 = vcvt.f32.s32 %v1016_v30  ;;  %1162 = vst.msk [vmem:[%s2580_s3 + $0x8] sm:$0xff] %vm1144_vm7, %v1129_v32  ;;  %v943_v30 = vcvt.f32.s32 %v2389_v34  ;;  %v753_v34 = vsel %vm726_vm5, %v1962_v38, 0  ;;  %v1079_v32 = vshll.u32 %v1078_v46, 16 }
 0x560   :  { %v885_v18 = vadd.s32 %v884_v26, %v882_v52  ;;  %v748_v52 = vsel %vm726_vm5, %v1954_v56, 0 }
 0x561   :  { %v1020_v35 = vadd.s32 %v1019_v44, %v1017_v22  ;;  %v1001_v2 = vpop.xlane.xlu0 %1000  ;;  %v988_v22 = vcvt.f32.s32 %v2394_v53 }
 0x562   :  { %v1128_v8 = vsel %vm1111_vm6, %v885_v18, %v743_v13  ;;  %v926_v27 = vpop.xlane.xlu1 %925  ;;  %v1002_v19 = vcvt.f32.s32 %v1001_v2  ;;  %v944_v2 = vshll.u32 %v943_v30, 16 }
 0x563   :  { %v1137_v58 = vsel %vm1111_vm6, %v1020_v35, %v752_v60  ;;  %1161 = vst.msk [vmem:[%s2580_s3] sm:$0xff] %vm1144_vm7, %v1128_v8  ;;  %v927_v45 = vcvt.f32.s32 %v926_v27  ;;  %v1063_v60 = vcvt.f32.s32 %v2399_v12  ;;  %v747_v12 = vsel %vm726_vm5, %v1981_v20, 0 }
 0x564   :  { %1170 = vst.msk [vmem:[%s2580_s3 + $0x48] sm:$0xff] %vm1144_vm7, %v1137_v58  ;;  %v1005_v57 = vadd.s32 %v1004_v31, %v1002_v19  ;;  %v756_v31 = vsel %vm726_vm5, %v1974_v49, 0  ;;  %v989_v19 = vshll.u32 %v988_v22, 16 }
 0x565   :  { %v930_v40 = vadd.s32 %v929_v16, %v927_v45  ;;  %v1108_v16 = vcvt.f32.s32 %v2404_v28  ;;  %v1064_v39 = vshll.u32 %v1063_v60, 16 }
 0x566   :  { %v1136_v0 = vsel %vm1111_vm6, %v1005_v57, %v751_v1  ;;  %v1046_v61 = vpop.xlane.xlu1 %1045  ;;  %v911_v42 = vpop.xlane.xlu0 %910  ;;  %v973_v57 = vcvt.f32.s32 %v2408_v51  ;;  %v750_v1 = vsel %vm726_vm5, %v1994_v25, 0 }
 0x567   :  { %v1131_v36 = vsel %vm1111_vm6, %v930_v40, %v746_v11  ;;  %1169 = vst.msk [vmem:[%s2580_s3 + $0x40] sm:$0xff] %vm1144_vm7, %v1136_v0  ;;  %v1047_v21 = vcvt.f32.s32 %v1046_v61  ;;  %v912_v17 = vcvt.f32.s32 %v911_v42  ;;  %v755_v11 = vsel %vm726_vm5, %v2001_v15, 0 }
 0x568   :  { %1164 = vst.msk [vmem:[%s2580_s3 + $0x18] sm:$0xff] %vm1144_vm7, %v1131_v36  ;;  %v1109_v0 = vshll.u32 %v1108_v16, 16  ;;  %v974_v36 = vshll.u32 %v973_v57, 16 }
 0x569   :  { %v1050_v48 = vadd.s32 %v1049_v54, %v1047_v21  ;;  %v915_v43 = vadd.s32 %v914_v14, %v912_v17  ;;  %v1093_v21 = vcvt.f32.s32 %v2413_v29  ;;  %v758_v14 = vsel %vm726_vm5, %v2013_v41, 0 }
 0x56a   :  { %v956_v37 = vpop.xlane.xlu1 %955  ;;  %v1031_v26 = vpop.xlane.xlu0 %1030 }
 0x56b   :  { %v1139_v10 = vsel %vm1111_vm6, %v1050_v48, %v754_v5  ;;  %v957_v6 = vcvt.f32.s32 %v956_v37  ;;  %v1130_v63 = vsel %vm1111_vm6, %v915_v43, %v745_v9  ;;  %v1032_v59 = vcvt.f32.s32 %v1031_v26 }
 0x56c   :  { %1172 = vst.msk [vmem:[%s2580_s3 + $0x58] sm:$0xff] %vm1144_vm7, %v1139_v10  ;;  %1163 = vst.msk [vmem:[%s2580_s3 + $0x10] sm:$0xff] %vm1144_vm7, %v1130_v63  ;;  %v1094_v5 = vshll.u32 %v1093_v21, 16 }
 0x56d   :  { %v960_v62 = vadd.s32 %v959_v50, %v957_v6  ;;  %v1035_v44 = vadd.s32 %v1034_v23, %v1032_v59 }
 0x56e   :  { %v1076_v24 = vpop.xlane.xlu1 %1075  ;;  %v941_v35 = vpop.xlane.xlu0 %940 }
 0x56f   :  { %v1133_v18 = vsel %vm1111_vm6, %v960_v62, %v748_v52  ;;  %v1077_v13 = vcvt.f32.s32 %v1076_v24  ;;  %v1138_v56 = vsel %vm1111_vm6, %v1035_v44, %v753_v34  ;;  %v942_v38 = vcvt.f32.s32 %v941_v35 }
 0x570   :  { %1166 = vst.msk [vmem:[%s2580_s3 + $0x28] sm:$0xff] %vm1144_vm7, %v1133_v18  ;;  %1171 = vst.msk [vmem:[%s2580_s3 + $0x50] sm:$0xff] %vm1144_vm7, %v1138_v56 }
 0x571   :  { %v1080_v53 = vadd.s32 %v1079_v32, %v1077_v13  ;;  %v945_v8 = vadd.s32 %v944_v2, %v942_v38 }
 0x572   :  { %v986_v27 = vpop.xlane.xlu1 %985  ;;  %v1061_v45 = vpop.xlane.xlu0 %1060 }
 0x573   :  { %v1141_v3 = vsel %vm1111_vm6, %v1080_v53, %v756_v31  ;;  %v987_v58 = vcvt.f32.s32 %v986_v27  ;;  %v1132_v49 = vsel %vm1111_vm6, %v945_v8, %v747_v12  ;;  %v1062_v20 = vcvt.f32.s32 %v1061_v45 }
 0x574   :  { %1174 = vst.msk [vmem:[%s2580_s3 + $0x68] sm:$0xff] %vm1144_vm7, %v1141_v3  ;;  %1165 = vst.msk [vmem:[%s2580_s3 + $0x20] sm:$0xff] %vm1144_vm7, %v1132_v49 }
 0x575   :  { %v990_v28 = vadd.s32 %v989_v19, %v987_v58  ;;  %v1065_v51 = vadd.s32 %v1064_v39, %v1062_v20 }
 0x576   :  { %v1106_v40 = vpop.xlane.xlu1 %1105  ;;  %v971_v47 = vpop.xlane.xlu0 %970 }
 0x577   :  { %v1135_v61 = vsel %vm1111_vm6, %v990_v28, %v750_v1  ;;  %v1107_v54 = vcvt.f32.s32 %v1106_v40  ;;  %v1140_v25 = vsel %vm1111_vm6, %v1065_v51, %v755_v11  ;;  %v972_v42 = vcvt.f32.s32 %v971_v47 }
 0x578   :  { %1168 = vst.msk [vmem:[%s2580_s3 + $0x38] sm:$0xff] %vm1144_vm7, %v1135_v61  ;;  %1173 = vst.msk [vmem:[%s2580_s3 + $0x60] sm:$0xff] %vm1144_vm7, %v1140_v25 }
 0x579   :  { %v1110_v15 = vadd.s32 %v1109_v0, %v1107_v54  ;;  %v975_v29 = vadd.s32 %v974_v36, %v972_v42 }
 0x57a   :  { %v1091_v48 = vpop.xlane.xlu0 %1090 }
 0x57b   :  { %v1143_v17 = vsel %vm1111_vm6, %v1110_v15, %v758_v14  ;;  %v1134_v9 = vsel %vm1111_vm6, %v975_v29, %v749_v55  ;;  %v1092_v43 = vcvt.f32.s32 %v1091_v48 }
 0x57c   :  { %1176 = vst.msk [vmem:[%s2580_s3 + $0x78] sm:$0xff] %vm1144_vm7, %v1143_v17  ;;  %1167 = vst.msk [vmem:[%s2580_s3 + $0x30] sm:$0xff] %vm1144_vm7, %v1134_v9 }
 0x57d   :  { %v1095_v41 = vadd.s32 %v1094_v5, %v1092_v43 }
 0x57f   :  { %v1142_v37 = vsel %vm1111_vm6, %v1095_v41, %v757_v33 }
 0x580   :  { %1175 = vst.msk [vmem:[%s2580_s3 + $0x70] sm:$0xff] %vm1144_vm7, %v1142_v37 }

</bundles_post_ra>
